<compile_context>
chip_gen: v7x
topology: tpu7x:2x2x1
jax: 0.10.0
libtpu: 0.0.40
codegen_flags: <defaults>
</compile_context>

<pallas_src>
import functools

import jax
import jax.numpy as jnp
from jax.experimental import pallas as pl
from jax.experimental.pallas import tpu as pltpu


def _round_up(n: int, m: int) -> int:
    return ((n + m - 1) // m) * m


def scale_prediction_kernel(xp_ref, w1_ref, scale_ref, shift_ref, w2_ref,
                            b2_ref, out_ref, im2col_ref, acc_ref=None,
                            *, n_c2, th, W, Cp):
    # xp_ref    : (1, H+2, W+2, Cp)  bf16, zero-padded NHWC image (whole image)
    # w1_ref    : (9*Cp, tc2)        bf16, C2-tile of im2col-packed 3x3 weights
    # scale/shift_ref : (1, tc2)     f32, folded inference BatchNorm (C2-tile)
    # w2_ref    : (tc2, Coutp) bf16, b2_ref : (1, Coutp) f32
    # out_ref   : (1, th*W, Coutp)   f32 (one spatial tile of one image)
    # im2col_ref: (th*W, 9*Cp)       bf16 scratch, built once per (b, h) tile
    # acc_ref   : (th*W, Coutp)      f32 scratch (only when n_c2 > 1)
    c2 = pl.program_id(2)
    h0 = pl.multiple_of(pl.program_id(1) * th, th)

    def _build_im2col():
        # Each tap writes one lane-aligned (multiple-of-128) column block of
        # the cached im2col buffer; done once per (image, spatial tile).
        for kh in range(3):
            for kw in range(3):
                t = kh * 3 + kw
                patch = xp_ref[0, pl.ds(h0 + kh, th), pl.ds(kw, W), :]
                im2col_ref[:, t * Cp:(t + 1) * Cp] = patch.reshape(th * W, Cp)

    if n_c2 > 1:
        @pl.when(c2 == 0)
        def _():
            _build_im2col()
    else:
        _build_im2col()

    # 3x3 "same" conv for this C2 tile as ONE fused matmul on the cached
    # im2col buffer (f32 MXU accumulation).
    conv = jnp.dot(im2col_ref[...], w1_ref[...],
                   preferred_element_type=jnp.float32)

    # Folded inference BatchNorm + LeakyReLU(0.1), single f32 pass.
    f = conv * scale_ref[...] + shift_ref[...]
    f = jnp.where(f > 0, f, 0.1 * f)

    # 1x1 conv == channel matmul.
    part = jnp.dot(f.astype(w2_ref.dtype), w2_ref[...],
                   preferred_element_type=jnp.float32)

    if n_c2 == 1:
        # Weights fully resident: write the tile directly, no accumulator RMW.
        out_ref[...] = (part + b2_ref[...])[None].astype(out_ref.dtype)
    else:
        @pl.when(c2 == 0)
        def _():
            acc_ref[...] = part

        @pl.when(c2 > 0)
        def _():
            acc_ref[...] += part

        @pl.when(c2 == n_c2 - 1)
        def _():
            out_ref[...] = (acc_ref[...] + b2_ref[...])[None].astype(out_ref.dtype)


def make_params(key, in_channels, num_classes):
    C = in_channels
    C2 = 2 * C
    Cout = 3 * (num_classes + 5)
    k1, k2, k3, k4, k5, k6 = jax.random.split(key, 6)
    eps = 1e-5
    w1 = 0.1 * jax.random.normal(k1, (3, 3, C, C2), jnp.float32)      # HWIO
    gamma = 1.0 + 0.1 * jax.random.normal(k2, (C2,), jnp.float32)
    beta = 0.1 * jax.random.normal(k3, (C2,), jnp.float32)
    running_mean = 0.1 * jax.random.normal(k4, (C2,), jnp.float32)
    running_var = jnp.abs(jax.random.normal(k5, (C2,), jnp.float32)) + 0.5
    bn_scale = gamma / jnp.sqrt(running_var + eps)
    bn_shift = beta - running_mean * bn_scale
    w2 = 0.1 * jax.random.normal(k6, (C2, Cout), jnp.float32)
    b2 = 0.05 * jnp.arange(Cout, dtype=jnp.float32)
    return dict(w1=w1, bn_scale=bn_scale, bn_shift=bn_shift, w2=w2, b2=b2)


def _vmem_capacity_bytes() -> int:
    # Generation-aware VMEM capacity; conservative fallback = v7x per-core.
    try:
        info = pltpu.get_tpu_info()
        cap = getattr(info, "vmem_capacity_bytes", None)
        if cap:
            return int(cap)
    except Exception:
        pass
    return 64 * 1024 * 1024


def scale_prediction(x_nchw, params, num_classes):
    B, C, H, W = x_nchw.shape
    C2 = 2 * C
    Cout = 3 * (num_classes + 5)

    # Lane-friendly padded channel counts. (For real YOLO heads C is already a
    # multiple of 128, so 9*Cp == 9*C and the im2col K dim carries no padding.)
    Cp = _round_up(C, 128)
    C2p = _round_up(C2, 128)
    Coutp = _round_up(Cout, 128)

    # ---- spatial tiling: feeds both v7x TensorCores even at B == 1 and
    #      shrinks per-step f32 temporaries / accumulator. ----
    n_h = 1
    for cand in (2, 4):
        if H % cand == 0 and ((H // cand) * W) % 8 == 0 and (H // cand) * W >= 64:
            n_h = cand
            break
    th = H // n_h
    M = th * W

    # ---- generation-aware VMEM budgeting and C2 tiling ----
    cap = _vmem_capacity_bytes()
    budget = int(cap * 0.8)

    def _need_bytes(tc2_):
        xp_b = (H + 2) * (W + 2) * Cp * 2
        w1_b = 9 * Cp * tc2_ * 2
        w2_b = tc2_ * Coutp * 2
        misc = 2 * tc2_ * 4 + Coutp * 4
        out_b = M * Coutp * 4
        scratch = M * 9 * Cp * 2 + (0 if tc2_ == C2p else M * Coutp * 4)
        return 2 * (xp_b + w1_b + w2_b + misc + out_b) + scratch

    tc2 = 128
    for cand in (C2p, 1024, 512, 256, 128):
        if cand <= C2p and C2p % cand == 0 and _need_bytes(cand) <= budget:
            tc2 = cand
            break
    n_c2 = C2p // tc2
    need = _need_bytes(tc2)
    vmem_limit = max(min(int(cap * 0.85), max(32 * 1024 * 1024, 2 * need)), need)
    vmem_limit = int(min(vmem_limit, cap))

    # NCHW -> NHWC, cast to bf16, halo + channel zero-pad (one fused XLA copy).
    # TODO(synk): keep x in HBM via memory_space=pl.ANY and DMA rows into a
    # halo/channel-padded VMEM scratch inside the kernel to remove this extra
    # HBM round trip of the padded activation.
    xp = jnp.pad(jnp.transpose(x_nchw, (0, 2, 3, 1)).astype(jnp.bfloat16),
                 ((0, 0), (1, 1), (1, 1), (0, Cp - C)))

    # 3x3 weights packed for the fused im2col matmul: (3,3,Cp,C2p) -> (9*Cp, C2p)
    # row index = (kh*3 + kw)*Cp + c_in, matching the im2col column ordering.
    w1 = jnp.pad(params['w1'].astype(jnp.bfloat16),
                 ((0, 0), (0, 0), (0, Cp - C), (0, C2p - C2))).reshape(9 * Cp, C2p)
    scale = jnp.pad(params['bn_scale'].astype(jnp.float32),
                    (0, C2p - C2)).reshape(1, C2p)
    shift = jnp.pad(params['bn_shift'].astype(jnp.float32),
                    (0, C2p - C2)).reshape(1, C2p)
    w2 = jnp.pad(params['w2'].astype(jnp.bfloat16),
                 ((0, C2p - C2), (0, Coutp - Cout)))
    b2 = jnp.pad(params['b2'].astype(jnp.float32),
                 (0, Coutp - Cout)).reshape(1, Coutp)

    # Optional deeper weight buffering: only when C2 is tiled (weight DMA is
    # the dominant per-step transfer) and VMEM capacity allows (v5e/v6e).
    if n_c2 >= 2 and cap >= 100 * 1024 * 1024 and need + 9 * Cp * tc2 * 2 <= budget:
        w1_spec = pl.BlockSpec((9 * Cp, tc2), lambda b, h, c: (0, c),
                               pipeline_mode=pl.Buffered(3))
    else:
        w1_spec = pl.BlockSpec((9 * Cp, tc2), lambda b, h, c: (0, c))

    scratch_shapes = [pltpu.VMEM((M, 9 * Cp), jnp.bfloat16)]      # cached im2col
    if n_c2 > 1:
        scratch_shapes.append(pltpu.VMEM((M, Coutp), jnp.float32))  # C2 accumulator

    kernel = functools.partial(scale_prediction_kernel,
                               n_c2=n_c2, th=th, W=W, Cp=Cp)

    flops = 2 * B * H * W * (9 * Cp * C2p + C2p * Coutp)
    w_fetches = 1 if n_c2 == 1 else B * n_h
    bytes_accessed = (xp.size * 2 + (w1.size + w2.size) * 2 * w_fetches
                      + (scale.size + shift.size + b2.size) * 4
                      + B * H * W * Coutp * 4)

    out_flat = pl.pallas_call(
        kernel,
        out_shape=jax.ShapeDtypeStruct((B, H * W, Coutp), jnp.float32),
        grid_spec=pltpu.PrefetchScalarGridSpec(
            num_scalar_prefetch=0,
            grid=(B, n_h, n_c2),
            in_specs=[
                pl.BlockSpec((1, H + 2, W + 2, Cp), lambda b, h, c: (b, 0, 0, 0)),
                w1_spec,
                pl.BlockSpec((1, tc2), lambda b, h, c: (0, c)),
                pl.BlockSpec((1, tc2), lambda b, h, c: (0, c)),
                pl.BlockSpec((tc2, Coutp), lambda b, h, c: (c, 0)),
                pl.BlockSpec((1, Coutp), lambda b, h, c: (0, 0)),
            ],
            out_specs=pl.BlockSpec((1, M, Coutp), lambda b, h, c: (b, h, 0)),
            scratch_shapes=scratch_shapes,
        ),
        compiler_params=pltpu.CompilerParams(
            dimension_semantics=("parallel", "parallel", "arbitrary"),
            vmem_limit_bytes=vmem_limit),
        cost_estimate=pl.CostEstimate(flops=flops, transcendentals=0,
                                      bytes_accessed=bytes_accessed),
    )(xp, w1, scale, shift, w2, b2)

    # (B, H*W, Coutp) -> slice padding -> (B, 3, H, W, nc+5) (torch view+permute).
    out = out_flat[:, :, :Cout].reshape(B, H, W, 3, num_classes + 5)
    return jnp.transpose(out, (0, 3, 1, 2, 4))


def scale_prediction_reference(x_nchw, params, num_classes):
    # Pure-JAX f32 NCHW reference for correctness checking.
    B, C, H, W = x_nchw.shape
    w1_oihw = jnp.transpose(params['w1'], (3, 2, 0, 1))       # (2C, C, 3, 3)
    f = jax.lax.conv_general_dilated(
        x_nchw.astype(jnp.float32), w1_oihw, (1, 1), ((1, 1), (1, 1)),
        dimension_numbers=('NCHW', 'OIHW', 'NCHW'))
    f = f * params['bn_scale'].reshape(1, -1, 1, 1) + params['bn_shift'].reshape(1, -1, 1, 1)
    f = jnp.where(f > 0, f, 0.1 * f)
    w2_oihw = params['w2'].T[:, :, None, None]                # (Cout, 2C, 1, 1)
    f = jax.lax.conv_general_dilated(
        f, w2_oihw, (1, 1), ((0, 0), (0, 0)),
        dimension_numbers=('NCHW', 'OIHW', 'NCHW'))
    f = f + params['b2'].reshape(1, -1, 1, 1)
    f = f.reshape(B, 3, num_classes + 5, H, W)
    return jnp.transpose(f, (0, 1, 3, 4, 2))


if __name__ == "__main__":
    B, C, H, W = 2, 4, 16, 16
    num_classes = 3

    key = jax.random.PRNGKey(0)
    kx, kp = jax.random.split(key)
    x = jax.random.normal(kx, (B, C, H, W), jnp.float32)   # torch-style NCHW input
    params = make_params(kp, C, num_classes)

    out = scale_prediction(x, params, num_classes)
    out = jax.block_until_ready(out)

    ref = scale_prediction_reference(x, params, num_classes)
    assert out.shape == (B, 3, H, W, num_classes + 5), out.shape
    # bf16 matmul inputs (f32 accumulation) -> loosened tolerance vs f32 ref.
    assert jnp.allclose(out, ref, atol=3e-2, rtol=3e-2), \
        float(jnp.max(jnp.abs(out - ref)))

    print("KERNEL_OK")
</pallas_src>

<mosaic_0001>
module attributes {stable_mosaic.version = 11 : i64} {
  func.func @scale_prediction_kernel(%arg0: i32, %arg1: i32, %arg2: i32, %arg3: memref<1x18x18x128xbf16, #tpu.memory_space<vmem>>, %arg4: memref<1152x128xbf16, #tpu.memory_space<vmem>>, %arg5: memref<1x128xf32, #tpu.memory_space<vmem>>, %arg6: memref<1x128xf32, #tpu.memory_space<vmem>>, %arg7: memref<128x128xbf16, #tpu.memory_space<vmem>>, %arg8: memref<1x128xf32, #tpu.memory_space<vmem>>, %arg9: memref<1x128x128xf32, #tpu.memory_space<vmem>>, %arg10: memref<128x1152xbf16, #tpu.memory_space<vmem>>) attributes {dimension_semantics = [#tpu.dimension_semantics<parallel>, #tpu.dimension_semantics<parallel>, #tpu.dimension_semantics<arbitrary>], iteration_bounds = array<i64: 2, 2, 1>, scalar_prefetch = 0 : i64, scratch_operands = 1 : i64, tpu.core_type = #tpu.core_type<tc>, window_params = [{transform_indices = @transform_0, window_bounds = array<i64: 1, 18, 18, 128>}, {transform_indices = @transform_1, window_bounds = array<i64: 1152, 128>}, {transform_indices = @transform_2, window_bounds = array<i64: 1, 128>}, {transform_indices = @transform_3, window_bounds = array<i64: 1, 128>}, {transform_indices = @transform_4, window_bounds = array<i64: 128, 128>}, {pipeline_mode = #tpu.pipeline_mode<synchronous>, transform_indices = @transform_5, window_bounds = array<i64: 1, 128>}, {transform_indices = @transform_6, window_bounds = array<i64: 1, 128, 128>}]} {
    %c8_i32 = arith.constant 8 : i32
    %0 = arith.muli %arg1, %c8_i32 : i32
    %1 = tpu.assume_multiple %0, 8 : i32
    %c0_i32 = arith.constant 0 : i32
    %2 = arith.addi %1, %c0_i32 : i32
    %c0 = arith.constant 0 : index
    %3 = arith.index_cast %2 : i32 to index
    %c0_0 = arith.constant 0 : index
    %c0_1 = arith.constant 0 : index
    %4 = vector.load %arg3[%c0, %3, %c0_0, %c0_1] : memref<1x18x18x128xbf16, #tpu.memory_space<vmem>>, vector<1x8x16x128xbf16>
    %5 = vector.shape_cast %4 : vector<1x8x16x128xbf16> to vector<8x16x128xbf16>
    %6 = vector.shape_cast %5 : vector<8x16x128xbf16> to vector<128x128xbf16>
    %c0_2 = arith.constant 0 : index
    %c0_3 = arith.constant 0 : index
    %7 = vector.load %arg10[%c0_2, %c0_3] : memref<128x1152xbf16, #tpu.memory_space<vmem>>, vector<128x128xbf16>
    tpu.vector_store %arg10[%c0_2, %c0_3], %6 {strides = array<i32>} : memref<128x1152xbf16, #tpu.memory_space<vmem>>, vector<128x128xbf16>,
    %c0_i32_4 = arith.constant 0 : i32
    %8 = arith.addi %1, %c0_i32_4 : i32
    %c0_5 = arith.constant 0 : index
    %9 = arith.index_cast %8 : i32 to index
    %c1 = arith.constant 1 : index
    %c0_6 = arith.constant 0 : index
    %10 = vector.load %arg3[%c0_5, %9, %c1, %c0_6] : memref<1x18x18x128xbf16, #tpu.memory_space<vmem>>, vector<1x8x16x128xbf16>
    %11 = vector.shape_cast %10 : vector<1x8x16x128xbf16> to vector<8x16x128xbf16>
    %12 = vector.shape_cast %11 : vector<8x16x128xbf16> to vector<128x128xbf16>
    %c0_7 = arith.constant 0 : index
    %c128 = arith.constant 128 : index
    %13 = vector.load %arg10[%c0_7, %c128] : memref<128x1152xbf16, #tpu.memory_space<vmem>>, vector<128x128xbf16>
    tpu.vector_store %arg10[%c0_7, %c128], %12 {strides = array<i32>} : memref<128x1152xbf16, #tpu.memory_space<vmem>>, vector<128x128xbf16>,
    %c0_i32_8 = arith.constant 0 : i32
    %14 = arith.addi %1, %c0_i32_8 : i32
    %c0_9 = arith.constant 0 : index
    %15 = arith.index_cast %14 : i32 to index
    %c2 = arith.constant 2 : index
    %c0_10 = arith.constant 0 : index
    %16 = vector.load %arg3[%c0_9, %15, %c2, %c0_10] : memref<1x18x18x128xbf16, #tpu.memory_space<vmem>>, vector<1x8x16x128xbf16>
    %17 = vector.shape_cast %16 : vector<1x8x16x128xbf16> to vector<8x16x128xbf16>
    %18 = vector.shape_cast %17 : vector<8x16x128xbf16> to vector<128x128xbf16>
    %c0_11 = arith.constant 0 : index
    %c256 = arith.constant 256 : index
    %19 = vector.load %arg10[%c0_11, %c256] : memref<128x1152xbf16, #tpu.memory_space<vmem>>, vector<128x128xbf16>
    tpu.vector_store %arg10[%c0_11, %c256], %18 {strides = array<i32>} : memref<128x1152xbf16, #tpu.memory_space<vmem>>, vector<128x128xbf16>,
    %c1_i32 = arith.constant 1 : i32
    %20 = arith.addi %1, %c1_i32 : i32
    %c0_12 = arith.constant 0 : index
    %21 = arith.index_cast %20 : i32 to index
    %c0_13 = arith.constant 0 : index
    %c0_14 = arith.constant 0 : index
    %22 = vector.load %arg3[%c0_12, %21, %c0_13, %c0_14] : memref<1x18x18x128xbf16, #tpu.memory_space<vmem>>, vector<1x8x16x128xbf16>
    %23 = vector.shape_cast %22 : vector<1x8x16x128xbf16> to vector<8x16x128xbf16>
    %24 = vector.shape_cast %23 : vector<8x16x128xbf16> to vector<128x128xbf16>
    %c0_15 = arith.constant 0 : index
    %c384 = arith.constant 384 : index
    %25 = vector.load %arg10[%c0_15, %c384] : memref<128x1152xbf16, #tpu.memory_space<vmem>>, vector<128x128xbf16>
    tpu.vector_store %arg10[%c0_15, %c384], %24 {strides = array<i32>} : memref<128x1152xbf16, #tpu.memory_space<vmem>>, vector<128x128xbf16>,
    %c1_i32_16 = arith.constant 1 : i32
    %26 = arith.addi %1, %c1_i32_16 : i32
    %c0_17 = arith.constant 0 : index
    %27 = arith.index_cast %26 : i32 to index
    %c1_18 = arith.constant 1 : index
    %c0_19 = arith.constant 0 : index
    %28 = vector.load %arg3[%c0_17, %27, %c1_18, %c0_19] : memref<1x18x18x128xbf16, #tpu.memory_space<vmem>>, vector<1x8x16x128xbf16>
    %29 = vector.shape_cast %28 : vector<1x8x16x128xbf16> to vector<8x16x128xbf16>
    %30 = vector.shape_cast %29 : vector<8x16x128xbf16> to vector<128x128xbf16>
    %c0_20 = arith.constant 0 : index
    %c512 = arith.constant 512 : index
    %31 = vector.load %arg10[%c0_20, %c512] : memref<128x1152xbf16, #tpu.memory_space<vmem>>, vector<128x128xbf16>
    tpu.vector_store %arg10[%c0_20, %c512], %30 {strides = array<i32>} : memref<128x1152xbf16, #tpu.memory_space<vmem>>, vector<128x128xbf16>,
    %c1_i32_21 = arith.constant 1 : i32
    %32 = arith.addi %1, %c1_i32_21 : i32
    %c0_22 = arith.constant 0 : index
    %33 = arith.index_cast %32 : i32 to index
    %c2_23 = arith.constant 2 : index
    %c0_24 = arith.constant 0 : index
    %34 = vector.load %arg3[%c0_22, %33, %c2_23, %c0_24] : memref<1x18x18x128xbf16, #tpu.memory_space<vmem>>, vector<1x8x16x128xbf16>
    %35 = vector.shape_cast %34 : vector<1x8x16x128xbf16> to vector<8x16x128xbf16>
    %36 = vector.shape_cast %35 : vector<8x16x128xbf16> to vector<128x128xbf16>
    %c0_25 = arith.constant 0 : index
    %c640 = arith.constant 640 : index
    %37 = vector.load %arg10[%c0_25, %c640] : memref<128x1152xbf16, #tpu.memory_space<vmem>>, vector<128x128xbf16>
    tpu.vector_store %arg10[%c0_25, %c640], %36 {strides = array<i32>} : memref<128x1152xbf16, #tpu.memory_space<vmem>>, vector<128x128xbf16>,
    %c2_i32 = arith.constant 2 : i32
    %38 = arith.addi %1, %c2_i32 : i32
    %c0_26 = arith.constant 0 : index
    %39 = arith.index_cast %38 : i32 to index
    %c0_27 = arith.constant 0 : index
    %c0_28 = arith.constant 0 : index
    %40 = vector.load %arg3[%c0_26, %39, %c0_27, %c0_28] : memref<1x18x18x128xbf16, #tpu.memory_space<vmem>>, vector<1x8x16x128xbf16>
    %41 = vector.shape_cast %40 : vector<1x8x16x128xbf16> to vector<8x16x128xbf16>
    %42 = vector.shape_cast %41 : vector<8x16x128xbf16> to vector<128x128xbf16>
    %c0_29 = arith.constant 0 : index
    %c768 = arith.constant 768 : index
    %43 = vector.load %arg10[%c0_29, %c768] : memref<128x1152xbf16, #tpu.memory_space<vmem>>, vector<128x128xbf16>
    tpu.vector_store %arg10[%c0_29, %c768], %42 {strides = array<i32>} : memref<128x1152xbf16, #tpu.memory_space<vmem>>, vector<128x128xbf16>,
    %c2_i32_30 = arith.constant 2 : i32
    %44 = arith.addi %1, %c2_i32_30 : i32
    %c0_31 = arith.constant 0 : index
    %45 = arith.index_cast %44 : i32 to index
    %c1_32 = arith.constant 1 : index
    %c0_33 = arith.constant 0 : index
    %46 = vector.load %arg3[%c0_31, %45, %c1_32, %c0_33] : memref<1x18x18x128xbf16, #tpu.memory_space<vmem>>, vector<1x8x16x128xbf16>
    %47 = vector.shape_cast %46 : vector<1x8x16x128xbf16> to vector<8x16x128xbf16>
    %48 = vector.shape_cast %47 : vector<8x16x128xbf16> to vector<128x128xbf16>
    %c0_34 = arith.constant 0 : index
    %c896 = arith.constant 896 : index
    %49 = vector.load %arg10[%c0_34, %c896] : memref<128x1152xbf16, #tpu.memory_space<vmem>>, vector<128x128xbf16>
    tpu.vector_store %arg10[%c0_34, %c896], %48 {strides = array<i32>} : memref<128x1152xbf16, #tpu.memory_space<vmem>>, vector<128x128xbf16>,
    %c2_i32_35 = arith.constant 2 : i32
    %50 = arith.addi %1, %c2_i32_35 : i32
    %c0_36 = arith.constant 0 : index
    %51 = arith.index_cast %50 : i32 to index
    %c2_37 = arith.constant 2 : index
    %c0_38 = arith.constant 0 : index
    %52 = vector.load %arg3[%c0_36, %51, %c2_37, %c0_38] : memref<1x18x18x128xbf16, #tpu.memory_space<vmem>>, vector<1x8x16x128xbf16>
    %53 = vector.shape_cast %52 : vector<1x8x16x128xbf16> to vector<8x16x128xbf16>
    %54 = vector.shape_cast %53 : vector<8x16x128xbf16> to vector<128x128xbf16>
    %c0_39 = arith.constant 0 : index
    %c1024 = arith.constant 1024 : index
    %55 = vector.load %arg10[%c0_39, %c1024] : memref<128x1152xbf16, #tpu.memory_space<vmem>>, vector<128x128xbf16>
    tpu.vector_store %arg10[%c0_39, %c1024], %54 {strides = array<i32>} : memref<128x1152xbf16, #tpu.memory_space<vmem>>, vector<128x128xbf16>,
    %c0_40 = arith.constant 0 : index
    %c0_41 = arith.constant 0 : index
    %56 = vector.load %arg10[%c0_40, %c0_41] : memref<128x1152xbf16, #tpu.memory_space<vmem>>, vector<128x1152xbf16>
    %c0_42 = arith.constant 0 : index
    %c0_43 = arith.constant 0 : index
    %57 = vector.load %arg4[%c0_42, %c0_43] : memref<1152x128xbf16, #tpu.memory_space<vmem>>, vector<1152x128xbf16>
    %cst = arith.constant dense<0.000000e+00> : vector<128x128xf32>
    %58 = tpu.matmul %56, %57, %cst {dimension_numbers = #tpu.dot_dimension_numbers<[1], [0], [0], [1], [0, 0, 1, 1], [], []>} : vector<128x1152xbf16>, vector<1152x128xbf16>, vector<128x128xf32> -> vector<128x128xf32>
    %c0_44 = arith.constant 0 : index
    %c0_45 = arith.constant 0 : index
    %59 = vector.load %arg5[%c0_44, %c0_45] : memref<1x128xf32, #tpu.memory_space<vmem>>, vector<1x128xf32>
    %60 = vector.broadcast %59 : vector<1x128xf32> to vector<128x128xf32>
    %61 = arith.mulf %58, %60 : vector<128x128xf32>
    %c0_46 = arith.constant 0 : index
    %c0_47 = arith.constant 0 : index
    %62 = vector.load %arg6[%c0_46, %c0_47] : memref<1x128xf32, #tpu.memory_space<vmem>>, vector<1x128xf32>
    %63 = vector.broadcast %62 : vector<1x128xf32> to vector<128x128xf32>
    %64 = arith.addf %61, %63 : vector<128x128xf32>
    %cst_48 = arith.constant 0.000000e+00 : f32
    %65 = vector.broadcast %cst_48 : f32 to vector<128x128xf32>
    %66 = arith.cmpf ogt, %64, %65 : vector<128x128xf32>
    %cst_49 = arith.constant 1.000000e-01 : f32
    %67 = vector.broadcast %cst_49 : f32 to vector<128x128xf32>
    %68 = arith.mulf %67, %64 : vector<128x128xf32>
    %69 = arith.select %66, %64, %68 : vector<128x128xi1>, vector<128x128xf32>
    %70 = arith.truncf %69 : vector<128x128xf32> to vector<128x128xbf16>
    %c0_50 = arith.constant 0 : index
    %c0_51 = arith.constant 0 : index
    %71 = vector.load %arg7[%c0_50, %c0_51] : memref<128x128xbf16, #tpu.memory_space<vmem>>, vector<128x128xbf16>
    %cst_52 = arith.constant dense<0.000000e+00> : vector<128x128xf32>
    %72 = tpu.matmul %70, %71, %cst_52 {dimension_numbers = #tpu.dot_dimension_numbers<[1], [0], [0], [1], [0, 0, 1, 1], [], []>} : vector<128x128xbf16>, vector<128x128xbf16>, vector<128x128xf32> -> vector<128x128xf32>
    %c0_53 = arith.constant 0 : index
    %c0_54 = arith.constant 0 : index
    %73 = vector.load %arg8[%c0_53, %c0_54] : memref<1x128xf32, #tpu.memory_space<vmem>>, vector<1x128xf32>
    %74 = vector.broadcast %73 : vector<1x128xf32> to vector<128x128xf32>
    %75 = arith.addf %72, %74 : vector<128x128xf32>
    %76 = vector.shape_cast %75 : vector<128x128xf32> to vector<1x128x128xf32>
    %c0_55 = arith.constant 0 : index
    %c0_56 = arith.constant 0 : index
    %c0_57 = arith.constant 0 : index
    %77 = vector.load %arg9[%c0_55, %c0_56, %c0_57] : memref<1x128x128xf32, #tpu.memory_space<vmem>>, vector<1x128x128xf32>
    tpu.vector_store %arg9[%c0_55, %c0_56, %c0_57], %76 {strides = array<i32>} : memref<1x128x128xf32, #tpu.memory_space<vmem>>, vector<1x128x128xf32>,
    return
  }
  func.func @transform_0(%arg0: i32, %arg1: i32, %arg2: i32) -> (i32, i32, i32, i32) {
    %c0_i32 = arith.constant 0 : i32
    %c0_i32_0 = arith.constant 0 : i32
    %c0_i32_1 = arith.constant 0 : i32
    %c0_i32_2 = arith.constant 0 : i32
    return %arg0, %c0_i32, %c0_i32_0, %c0_i32_1 : i32, i32, i32, i32
  }
  func.func @transform_1(%arg0: i32, %arg1: i32, %arg2: i32) -> (i32, i32) {
    %c0_i32 = arith.constant 0 : i32
    %c0_i32_0 = arith.constant 0 : i32
    return %c0_i32, %arg2 : i32, i32
  }
  func.func @transform_2(%arg0: i32, %arg1: i32, %arg2: i32) -> (i32, i32) {
    %c0_i32 = arith.constant 0 : i32
    %c0_i32_0 = arith.constant 0 : i32
    return %c0_i32, %arg2 : i32, i32
  }
  func.func @transform_3(%arg0: i32, %arg1: i32, %arg2: i32) -> (i32, i32) {
    %c0_i32 = arith.constant 0 : i32
    %c0_i32_0 = arith.constant 0 : i32
    return %c0_i32, %arg2 : i32, i32
  }
  func.func @transform_4(%arg0: i32, %arg1: i32, %arg2: i32) -> (i32, i32) {
    %c0_i32 = arith.constant 0 : i32
    %c0_i32_0 = arith.constant 0 : i32
    return %arg2, %c0_i32 : i32, i32
  }
  func.func @transform_5(%arg0: i32, %arg1: i32, %arg2: i32) -> (i32, i32) {
    %c0_i32 = arith.constant 0 : i32
    %c0_i32_0 = arith.constant 0 : i32
    %c0_i32_1 = arith.constant 0 : i32
    return %c0_i32, %c0_i32_0 : i32, i32
  }
  func.func @transform_6(%arg0: i32, %arg1: i32, %arg2: i32) -> (i32, i32, i32) {
    %c0_i32 = arith.constant 0 : i32
    %c0_i32_0 = arith.constant 0 : i32
    return %arg0, %arg1, %c0_i32 : i32, i32, i32
  }
}

</mosaic_0001>

<bundles_post_ra>
// kernel: tpu_custom_call.1
= control target key start
LH: loop header
LB: loop body
LE: loop exit
PB: predicated region body
PF: predicated region fallthrough
CT: control target
= control target key end

     0   :  { %11 = vsyncpa [#allocation4], 0  ;;  %s5269_s0 = inlined_call_operand.vmem [shape: bf16[2,18,18,128], index: 0, kind: input, shape index: {}]   ;;  %s5270_s1 = inlined_call_operand.vmem [shape: bf16[1152,128], index: 1, kind: input, shape index: {}]   ;;  %s5271_s2 = inlined_call_operand.vmem [shape: f32[1,128], index: 2, kind: input, shape index: {}]   ;;  %s5272_s3 = inlined_call_operand.vmem [shape: f32[1,128], index: 3, kind: input, shape index: {}]   ;;  %s5273_s4 = inlined_call_operand.vmem [shape: bf16[128,128], index: 4, kind: input, shape index: {}]   ;;  %s5274_s5 = inlined_call_operand.vmem [shape: f32[1,128], index: 5, kind: input, shape index: {}]   ;;  %s5275_s6 = inlined_call_operand.hbm [shape: f32[2,256,128], index: 6, kind: output, shape index: {}]  }
   0x1   :  { %13 = vsyncpa [#allocation4 + $0x1], 0  ;;  %s4348_s21 = smov 0   ;;  %s4350_s22 = smov 0  }
   0x2   :  { %s4352_s23 = smov 0   ;;  %s4354_s24 = smov 0  }
   0x3   :  { %s4356_s25 = smov 0   ;;  %s4358_s26 = smov 0  }
   0x4   :  { %s4360_s27 = smov 0   ;;  %s4362_s28 = smov 0  }
   0x5 LB: > { %s3352_s29 = sadd.s32 4294967295, %s4308_s28   ;;  %s3353_s30 = sadd.s32 4294967294, %s4308_s28   ;;  %s4308_s28 = sphi %s4362_s28, %s19_s28   ;;  %s4304_s27 = sphi %s4360_s27, %s5294_s27   ;;  %s4300_s26 = sphi %s4358_s26, %s5293_s26   ;;  %s4296_s25 = sphi %s4356_s25, %s5292_s25   ;;  %s4292_s24 = sphi %s4354_s24, %s5291_s24   ;;  %s4288_s23 = sphi %s4352_s23, %s5290_s23   ;;  %s4284_s22 = sphi %s4350_s22, %s5289_s22   ;;  %s4280_s21 = sphi %s4348_s21, %s5288_s21  }
   0x6   : > { %s34_s7 = sadd.s32 1, %s4300_s26  ;;  %s38_s8 = sadd.s32 1, %s4304_s27 }
   0x7   : > { %p36_p0 = scmp.ge.s32.totalorder %s34_s7, 2  ;;  %p208_p1 = scmp.ne.s32.totalorder %s4288_s23, %s4284_s22 }
   0x8   : > { %p209_p2 = scmp.eq.s32.totalorder %s3352_s29, 3  ;;  %p214_p5 = scmp.ne.s32.totalorder %s4284_s22, %s4280_s21 }
   0x9   : > { %s5296_s7 = smov (%p36_p0, %s34_s7), 0  ;;  %s5298_s8 = smov (!%p36_p0, %s38_s8), %s4304_s27 }
   0xa   : > { %5278 = sst [smem:[#allocation6_spill]] %s5296_s7  ;;  %s194_s9 = ssub.s32 %s4300_s26, %s5296_s7 }
   0xb   : > { %p4399_p3 = por %p209_p2, %p208_p1  ;;  %p40_p4 = scmp.ge.s32.totalorder %s5298_s8, 2 }
   0xc   : > { %p215_p6 = scmp.eq.s32.totalorder %s3353_s30, 3  ;;  %p3360_p7 = scmp.ge.s32.totalorder %s4308_s28, 1 }
   0xd   : > { %s5300_s8 = smov (%p40_p4, %s5298_s8), 0  ;;  %p272_p9 = scmp.lt.s32.totalorder %s4308_s28, 5 }
   0xe   : > { %5280 = sst [smem:[#allocation7_spill]] %s5300_s8  ;;  %p4408_p8 = por %p215_p6, %p214_p5 }
   0xf   : > { %s193_s12 = ssub.s32 %s4304_s27, %s5300_s8  ;;  %s198_s13 = sadd.s32 1, %s4288_s23 }
  0x10   : > { %s195_s14 = sor.u32 %s194_s9, %s193_s12  ;;  %p273_p10 = pnand %p3360_p7, %p272_p9 }
  0x11   : > { %p196_p11 = scmp.eq.s32.totalorder %s195_s14, 0  ;;  %v4110_v0 = vld [vmem:[%s5270_s1 + $0x40] sm:$0xff] (!%p273_p10)   ;;  %v4114_v4 = vld [vmem:[%s5270_s1 + $0x48] sm:$0xff] (!%p273_p10)   ;;  %v4118_v8 = vld [vmem:[%s5270_s1 + $0x50] sm:$0xff] (!%p273_p10)   ;;  %p317_p12 = scmp.lt.s32.totalorder (!%p273_p10), %s4296_s25, 1  ;;  %vm723_vm0 = vcmask (!%p273_p10), 1042432  }
  0x12   : > { %276 = sbr.rel (%p273_p10) target bundleno = 669 (0x29d), region = 44  ;;  %v4111_v1 = vld [vmem:[%s5270_s1 + $0xc0] sm:$0xff] (!%p273_p10)   ;;  %3684 = vmatprep.subr.bf16.mxu0 (!%p273_p10), %v4110_v0  ;;  %v4115_v5 = vld [vmem:[%s5270_s1 + $0xc8] sm:$0xff] (!%p273_p10)   ;;  %v4119_v9 = vld [vmem:[%s5270_s1 + $0xd0] sm:$0xff] (!%p273_p10)   ;;  %vm724_vm1 = vcmask (!%p273_p10), 1046532   ;;  %s3678_s14 = sshll.u32 (!%p273_p10), %s4292_s24, 4 }
  0x13   : > { %s4417_s15 = scalar_select %p196_p11, %s4288_s23, %s198_s13  }
  0x14   : > { %v4112_v2 = vld [vmem:[%s5270_s1] sm:$0xff] (!%p273_p10)   ;;  %3748 = vmatprep.subr.bf16.mxu1 (!%p273_p10), %v4111_v1  ;;  %v4116_v6 = vld [vmem:[%s5270_s1 + $0x8] sm:$0xff] (!%p273_p10)   ;;  %v4120_v10 = vld [vmem:[%s5270_s1 + $0x10] sm:$0xff] (!%p273_p10)   ;;  %s3683_s16 = smul.u32 (!%p273_p10), 96, %s4292_s24  ;;  %vm440_vm2 = vsmask.f32 (!%p273_p10), 3328 }
  0x15   : > { %v4113_v3 = vld [vmem:[%s5270_s1 + $0x80] sm:$0xff] (!%p273_p10)   ;;  %3685 = vmatpush3.bf16.msra.mxu0 (!%p273_p10), %v4112_v2  ;;  %v4117_v7 = vld [vmem:[%s5270_s1 + $0x88] sm:$0xff] (!%p273_p10)   ;;  %v4121_v11 = vld [vmem:[%s5270_s1 + $0x90] sm:$0xff] (!%p273_p10)   ;;  %vm441_vm3 = vsmask.f32 (!%p273_p10), 7440  ;;  %s3679_s8 = sshll.u32 (!%p273_p10), %s4296_s25, 5 }
  0x16   : > { %3749 = vmatpush3.bf16.msra.mxu1 (!%p273_p10), %v4113_v3  ;;  %3686 = vmatprep.subr.bf16.mxu0 (!%p273_p10), %v4114_v4  ;;  %v4122_v12 = vld [vmem:[%s5270_s1 + $0x58] sm:$0xff] (!%p273_p10)   ;;  %v4126_v16 = vld [vmem:[%s5270_s1 + $0x60] sm:$0xff] (!%p273_p10)   ;;  %v4130_v20 = vld [vmem:[%s5270_s1 + $0x68] sm:$0xff] (!%p273_p10)  }
  0x17   : > { %3750 = vmatprep.subr.bf16.mxu1 (!%p273_p10), %v4115_v5  ;;  %v4123_v13 = vld [vmem:[%s5270_s1 + $0xd8] sm:$0xff] (!%p273_p10)   ;;  %v4127_v17 = vld [vmem:[%s5270_s1 + $0xe0] sm:$0xff] (!%p273_p10)   ;;  %v4131_v21 = vld [vmem:[%s5270_s1 + $0xe8] sm:$0xff] (!%p273_p10)  }
  0x18   : > { %v4124_v14 = vld [vmem:[%s5270_s1 + $0x18] sm:$0xff] (!%p273_p10)   ;;  %v4128_v18 = vld [vmem:[%s5270_s1 + $0x20] sm:$0xff] (!%p273_p10)   ;;  %v4132_v22 = vld [vmem:[%s5270_s1 + $0x28] sm:$0xff] (!%p273_p10)  }
  0x19   : > { %3687 = vmatpush3.bf16.msra.mxu0 %v4116_v6  ;;  %v4125_v15 = vld [vmem:[%s5270_s1 + $0x98] sm:$0xff]   ;;  %s318_s29 = scalar_select %p317_p12, %s4296_s25, 1  ;;  %v4129_v19 = vld [vmem:[%s5270_s1 + $0xa0] sm:$0xff]   ;;  %v4133_v23 = vld [vmem:[%s5270_s1 + $0xa8] sm:$0xff]  }
  0x1a   : > { %3751 = vmatpush3.bf16.msra.mxu1 %v4117_v7  ;;  %3688 = vmatprep.subr.bf16.mxu0 %v4118_v8  ;;  %v4134_v24 = vld [vmem:[%s5270_s1 + $0x70] sm:$0xff]   ;;  %v4138_v28 = vld [vmem:[%s5270_s1 + $0x78] sm:$0xff]   ;;  %vm4529_vm4 = vmor %vm723_vm0, %vm724_vm1 }
  0x1b   : > { %3752 = vmatprep.subr.bf16.mxu1 %v4119_v9  ;;  %s4036_s19 = smul.u32 216, %s318_s29  ;;  %v4135_v25 = vld [vmem:[%s5270_s1 + $0xf0] sm:$0xff]   ;;  %v4139_v29 = vld [vmem:[%s5270_s1 + $0xf8] sm:$0xff]   ;;  %vm4538_vm5 = vmor %vm440_vm2, %vm441_vm3 }
  0x1c   : > { %v4136_v26 = vld [vmem:[%s5270_s1 + $0x30] sm:$0xff]   ;;  %v4140_v30 = vld [vmem:[%s5270_s1 + $0x38] sm:$0xff]   ;;  %v4144_v56 = vld [vmem:[%s5270_s1 + $0x140] sm:$0xff]  }
  0x1d   : > { %3689 = vmatpush3.bf16.msra.mxu0 %v4120_v10  ;;  %s321_s20 = scalar_lea.vmem %s5269_s0, %s4036_s19  ;;  %v4137_v27 = vld [vmem:[%s5270_s1 + $0xb0] sm:$0xff]   ;;  %v4141_v31 = vld [vmem:[%s5270_s1 + $0xb8] sm:$0xff]   ;;  %v4145_v10 = vld [vmem:[%s5270_s1 + $0x100] sm:$0xff]   ;;  %s3206_s19 = sadd.s32 %s3679_s8, %s3678_s14 }
  0x1e   : > { %3753 = vmatpush3.bf16.msra.mxu1 %v4121_v11  ;;  %3690 = vmatprep.subr.bf16.mxu0 %v4122_v12  ;;  %s4515_s17 = scalar_lea.vmem %s321_s20, %s3683_s16  ;;  %s314_s20 = sand.u32 1, %s4284_s22  }
  0x1f   : > { %3754 = vmatprep.subr.bf16.mxu1 %v4123_v13  ;;  %v416_v32 = vld [vmem:[%s4515_s17] sm:$0xf]  ;;  %v417_v33 = vld [vmem:[%s4515_s17 + $0x4] sm:$0xf]  ;;  %v418_v34 = vld [vmem:[%s4515_s17 + $0x8] sm:$0x1] }
  0x20   : > { %v444_v35 = vshrl.u32 %v416_v32, 16  ;;  %v447_v36 = vshll.u32 %v416_v32, 16  ;;  %v453_v37 = vshll.u32 %v417_v33, 16  ;;  %v457_v38 = vshrl.u32 %v417_v33, 16  ;;  %v4142_v40 = vld [vmem:[%s4515_s17 + $0xc] sm:$0xff]   ;;  %v4143_v59 = vld [vmem:[%s4515_s17] sm:$0xff]  }
  0x21   : > { %3691 = vmatpush3.bf16.msra.mxu0 %v4124_v14  ;;  %v463_v39 = vshll.u32 %v418_v34, 16  ;;  %2551 = vmatprep.mubr.bf16.mxu1 %v4142_v40  ;;  %v675_v48 = vld [vmem:[%s4515_s17] sm:$0xe]  ;;  %v676_v49 = vld [vmem:[%s4515_s17 + $0x4] sm:$0xf]  ;;  %v4146_v13 = vld [vmem:[%s4515_s17 + $0x18] sm:$0xff]  }
  0x22   : > { %3755 = vmatpush3.bf16.msra.mxu1 %v4125_v15  ;;  %3692 = vmatprep.subr.bf16.mxu0 %v4126_v16  ;;  %v446_v41 = vrot.slane %v444_v35, 4  ;;  %v449_v42 = vrot.slane %v447_v36, 5  ;;  %v455_v43 = vrot.slane %v453_v37, 5  ;;  %v459_v44 = vrot.slane %v457_v38, 4  ;;  %v677_v50 = vld [vmem:[%s4515_s17 + $0x8] sm:$0x1] }
  0x23   : > { %3756 = vmatprep.subr.bf16.mxu1 %v4127_v17  ;;  %v465_v45 = vrot.slane %v463_v39, 5  ;;  %v3382_v53 = vrot.slane %v675_v48, 9  ;;  %v728_v54 = vrot.slane %v676_v49, 5  ;;  %v731_v55 = vrot.slane %v677_v50, 5  ;;  %v419_v62 = vld [vmem:[%s4515_s17 + $0xc] sm:$0xf] }
  0x24   : > { %v450_v47 = vor.u32 %v449_v42, %v446_v41  ;;  %v460_v52 = vor.u32 %v459_v44, %v455_v43  ;;  %v420_v0 = vld [vmem:[%s4515_s17 + $0x10] sm:$0xf]  ;;  %v421_v1 = vld [vmem:[%s4515_s17 + $0x14] sm:$0x1]  ;;  %v468_v2 = vshrl.u32 %v419_v62, 16  ;;  %v471_v3 = vshll.u32 %v419_v62, 16 }
  0x25   : > { %3693 = vmatpush3.bf16.msra.mxu0 %v4128_v18  ;;  %v729_v60 = vsel %vm4529_vm4, %v3382_v53, %v728_v54  ;;  %v730_v61 = vrot.slane %v728_v54, 4  ;;  %v477_v6 = vshll.u32 %v420_v0, 16  ;;  %v481_v7 = vshrl.u32 %v420_v0, 16  ;;  %v4148_v17 = vld [vmem:[%s5270_s1 + $0x148] sm:$0xff]   ;;  %v422_v33 = vld [vmem:[%s4515_s17 + $0x18] sm:$0xf] }
  0x26   : > { %3757 = vmatpush3.bf16.msra.mxu1 %v4129_v19  ;;  %3694 = vmatprep.subr.bf16.mxu0 %v4130_v20  ;;  %v451_v57 = vrot.slane %v450_v47, 4  ;;  %v461_v58 = vrot.slane %v460_v52, 4  ;;  %v470_v11 = vrot.slane %v468_v2, 4  ;;  %v473_v12 = vrot.slane %v471_v3, 5  ;;  %v678_v19 = vld [vmem:[%s4515_s17 + $0xc] sm:$0xe] }
  0x27   : > { %3758 = vmatprep.subr.bf16.mxu1 %v4131_v21  ;;  %v732_v5 = vsel %vm4529_vm4, %v730_v61, %v731_v55  ;;  %v479_v14 = vrot.slane %v477_v6, 5  ;;  %v483_v15 = vrot.slane %v481_v7, 4  ;;  %v487_v16 = vshll.u32 %v421_v1, 16  ;;  %v679_v20 = vld [vmem:[%s4515_s17 + $0x10] sm:$0xf]  ;;  %v4150_v48 = vld [vmem:[%s4515_s17 + $0x24] sm:$0xff]  }
  0x28   : > { %v456_v63 = vsel %vm4538_vm5, %v451_v57, %v455_v43  ;;  %v466_v4 = vsel %vm4538_vm5, %v461_v58, %v465_v45  ;;  %v3390_v9 = vcombine.low %v729_v60, %v732_v5  ;;  %v474_v18 = vor.u32 %v473_v12, %v470_v11  ;;  %v680_v21 = vld [vmem:[%s4515_s17 + $0x14] sm:$0x1]  ;;  %v423_v35 = vld [vmem:[%s4515_s17 + $0x1c] sm:$0xf]  ;;  %v424_v36 = vld [vmem:[%s4515_s17 + $0x20] sm:$0x1] }
  0x29   : > { %3695 = vmatpush3.bf16.msra.mxu0 %v4132_v22  ;;  %v3374_v8 = vcombine.low %v456_v63, %v466_v4  ;;  %v484_v22 = vor.u32 %v483_v15, %v479_v14  ;;  %v492_v37 = vshrl.u32 %v422_v33, 16  ;;  %v495_v38 = vshll.u32 %v422_v33, 16  ;;  %v4152_v53 = vld [vmem:[%s5270_s1 + $0x150] sm:$0xff]   ;;  %v681_v55 = vld [vmem:[%s4515_s17 + $0x18] sm:$0xe]  ;;  %s3361_s30 = sshll.u32 %s314_s20, 7 }
  0x2a   : > { %3759 = vmatpush3.bf16.msra.mxu1 %v4133_v23  ;;  %3696 = vmatprep.subr.bf16.mxu0 %v4134_v24  ;;  %v489_v23 = vrot.slane %v487_v16, 5  ;;  %v3383_v24 = vrot.slane %v678_v19, 9  ;;  %v501_v41 = vshll.u32 %v423_v35, 16  ;;  %v505_v42 = vshrl.u32 %v423_v35, 16  ;;  %v683_v57 = vld [vmem:[%s4515_s17 + $0x20] sm:$0x1] }
  0x2b   : > { %3760 = vmatprep.subr.bf16.mxu1 %v4135_v25  ;;  %2454 = vmatprep.mubr.bf16.mxu0 %v3374_v8  ;;  %v735_v25 = vrot.slane %v679_v20, 5  ;;  %v494_v45 = vrot.slane %v492_v37, 4  ;;  %v497_v47 = vrot.slane %v495_v38, 5  ;;  %v511_v52 = vshll.u32 %v424_v36, 16  ;;  %v4153_v62 = vld [vmem:[%s5270_s1 + $0x110] sm:$0xff]   ;;  %v4151_v2 = vld [vmem:[%s4515_s17 + $0x18] sm:$0xff]  }
  0x2c   : > { %v503_v49 = vrot.slane %v501_v41, 5  ;;  %v507_v50 = vrot.slane %v505_v42, 4  ;;  %v3384_v60 = vrot.slane %v681_v55, 9  ;;  %v745_v0 = vrot.slane %v683_v57, 5  ;;  %v425_v5 = vld [vmem:[%s4515_s17 + $0x24] sm:$0xf] }
  0x2d   : > { %3697 = vmatpush3.bf16.msra.mxu0 %v4136_v26  ;;  %v4149_v26 = vld [vmem:[%s5270_s1 + $0x108] sm:$0xff]   ;;  %v737_v32 = vrot.slane %v735_v25, 4  ;;  %v498_v54 = vor.u32 %v497_v47, %v494_v45  ;;  %v4154_v19 = vld [vmem:[%s4515_s17 + $0x30] sm:$0xff]   ;;  %s5187_s13 = scalar_lea.vmem [#allocation3], %s3361_s30  ;;  %s5217_s16 = scalar_lea.sflag [#allocation4], %s314_s20 }
  0x2e   : > { %3761 = vmatpush3.bf16.msra.mxu1 %v4137_v27  ;;  %3698 = vmatprep.subr.bf16.mxu0 %v4138_v28  ;;  %v475_v27 = vrot.slane %v474_v18, 4  ;;  %v738_v28 = vrot.slane %v680_v21, 5  ;;  %v508_v58 = vor.u32 %v507_v50, %v503_v49  ;;  %v426_v7 = vld [vmem:[%s4515_s17 + $0x28] sm:$0xf]  ;;  %v427_v8 = vld [vmem:[%s4515_s17 + $0x2c] sm:$0x1] }
  0x2f   : > { %3762 = vmatprep.subr.bf16.mxu1 %v4139_v29  ;;  %v485_v29 = vrot.slane %v484_v22, 4  ;;  %v499_v63 = vrot.slane %v498_v54, 4  ;;  %v535_v22 = vshll.u32 %v427_v8, 16  ;;  %v4155_v36 = vld [vmem:[%s4515_s17 + $0x24] sm:$0xff]   ;;  %s3209_s7 = sshll.u32 %s5187_s13, 4  ;;  %s4310_s30 = smov [#allocation3]   ;;  %s5210_s7 = int_to_ptr.vmem [resolvable:$true] %s3209_s7 }
  0x30   : > { %v480_v34 = vsel %vm4538_vm5, %v475_v27, %v479_v14  ;;  %v739_v40 = vsel %vm4529_vm4, %v737_v32, %v738_v28  ;;  %v509_v1 = vrot.slane %v508_v58, 4  ;;  %v529_v14 = vshrl.u32 %v426_v7, 16  ;;  %v686_v27 = vld [vmem:[%s4515_s17 + $0x2c] sm:$0x1]  ;;  %v4157_v32 = vld [vmem:[%s5270_s1 + $0x118] sm:$0xff]   ;;  %v4163_v8 = vld [vmem:[%s5270_s1 + $0x120] sm:$0xff]  }
  0x31   : > { %3699 = vmatpush3.bf16.msra.mxu0 %v4140_v30  ;;  %v4147_v30 = vld [vmem:[%s4515_s17 + $0xc] sm:$0xff]   ;;  %v490_v39 = vsel %vm4538_vm5, %v485_v29, %v489_v23  ;;  %v504_v6 = vsel %vm4538_vm5, %v499_v63, %v503_v49  ;;  %v4156_v23 = vld [vmem:[%s5270_s1 + $0x158] sm:$0xff]   ;;  %v537_v29 = vrot.slane %v535_v22, 5  ;;  %v433_v22 = vld [vmem:[%s4515_s17 + $0x44] sm:$0x1]  ;;  %s4214_s29 = scalar_lea.vmem %s5210_s7, 2048 }
  0x32   : > { %3763 = vmatpush3.bf16.msra.mxu1 %v4141_v31  ;;  %3812 = vmatprep.subr.bf16.mxu0 %v4144_v56  ;;  %v736_v31 = vsel %vm4529_vm4, %v3383_v24, %v735_v25  ;;  %v3375_v43 = vcombine.low %v480_v34, %v490_v39  ;;  %v682_v56 = vld [vmem:[%s4515_s17 + $0x1c] sm:$0xf]  ;;  %v531_v21 = vrot.slane %v529_v14, 4  ;;  %v684_v25 = vld [vmem:[%s4515_s17 + $0x24] sm:$0xe]  ;;  %v752_v34 = vrot.slane %v686_v27, 5  ;;  %p4215_p13 = scmp.ne.s32.totalorder %s5210_s7, %s4214_s29 }
  0x33   : > { %v3391_v44 = vcombine.low %v736_v31, %v739_v40  ;;  %v742_v61 = vrot.slane %v682_v56, 5  ;;  %v4158_v40 = vld [vmem:[%s5270_s1 + $0x1c0] sm:$0xff]   ;;  %v430_v49 = vld [vmem:[%s4515_s17 + $0x38] sm:$0x1]  ;;  %v687_v63 = vld [vmem:[%s4515_s17 + $0x30] sm:$0xe] }
  0x34   : > { %2455 = vmatmul.mubr.bf16.vlgmr.msra.gmra.mrb[0].mxu0 %v4143_v59  ;;  %v513_v59 = vrot.slane %v511_v52, 5  ;;  %3876 = vmatprep.subr.bf16.mxu1 %v4158_v40  ;;  %v559_v55 = vshll.u32 %v430_v49, 16  ;;  %v4160_v56 = vld [vmem:[%s4515_s17 + $0x3c] sm:$0xff]   ;;  %v4164_v14 = vld [vmem:[%s5270_s1 + $0x1c8] sm:$0xff]   ;;  %v583_v27 = vshll.u32 %v433_v22, 16  ;;  %p4216_p0 = pnand %p4215_p13, %p4399_p3  ;;  %s4218_s9 = sshll.u32 %s4310_s30, 4  ;;  %s4219_s9 = int_to_ptr.vmem [resolvable:$false] %s4218_s9 }
  0x35   : > { %2552 = vmatmul.mubr.bf16.vlgmr.msra.gmra.mrb[0].mxu1 %v3390_v9  ;;  %3813 = vmatpush3.bf16.msra.mxu0 %v4145_v10  ;;  %v743_v3 = vsel %vm4529_vm4, %v3384_v60, %v742_v61  ;;  %v744_v4 = vrot.slane %v742_v61, 4  ;;  %v516_v9 = vshrl.u32 %v425_v5, 16  ;;  %v519_v10 = vshll.u32 %v425_v5, 16  ;;  %s4220_s12 = scalar_lea.vmem %s4219_s9, 4096  ;;  %p4221_p2 = scmp.lt.s32.totalorder %s5210_s7, %s4219_s9 }
  0x36   : > { %2559 = vmatprep.mubr.bf16.mxu1 %v4146_v13  ;;  %3814 = vmatprep.subr.bf16.mxu0 %v4148_v17  ;;  %v514_v11 = vsel %vm4538_vm5, %v509_v1, %v513_v59  ;;  %v525_v13 = vshll.u32 %v426_v7, 16  ;;  %v561_v61 = vrot.slane %v559_v55, 5  ;;  %v689_v1 = vld [vmem:[%s4515_s17 + $0x38] sm:$0x1]  ;;  %v4171_v55 = vld [vmem:[%s5270_s1 + $0x190] sm:$0xff]   ;;  %p4217_p1 = pneg %p4216_p0  ;;  %p4222_p4 = scmp.lt.s32.totalorder %s4220_s12, %s4214_s29 }
  0x37   : > { %2462 = vmatprep.mubr.bf16.mxu0 %v3375_v43  ;;  %v746_v12 = vsel %vm4529_vm4, %v744_v4, %v745_v0  ;;  %v3376_v15 = vcombine.low %v504_v6, %v514_v11  ;;  %v518_v17 = vrot.slane %v516_v9, 4  ;;  %v521_v18 = vrot.slane %v519_v10, 5  ;;  %v4159_v43 = vld [vmem:[%s5270_s1 + $0x180] sm:$0xff]   ;;  %v688_v0 = vld [vmem:[%s4515_s17 + $0x34] sm:$0xf] }
  0x38   : > { %v3392_v16 = vcombine.low %v743_v3, %v746_v12  ;;  %v527_v20 = vrot.slane %v525_v13, 5  ;;  %3877 = vmatpush3.bf16.msra.mxu1 %v4159_v43  ;;  %v3386_v3 = vrot.slane %v687_v63, 9  ;;  %v756_v4 = vrot.slane %v688_v0, 5  ;;  %v4162_v6 = vld [vmem:[%s5270_s1 + $0x160] sm:$0xff]   ;;  %v4161_v10 = vld [vmem:[%s4515_s17 + $0x30] sm:$0xff]   ;;  %p4223_p5 = por %p4222_p4, %p4221_p2 }
  0x39   : > { %3815 = vmatpush3.bf16.msra.mxu0 %v4149_v26  ;;  %v522_v24 = vor.u32 %v521_v18, %v518_v17  ;;  %v685_v26 = vld [vmem:[%s4515_s17 + $0x28] sm:$0xf]  ;;  %v759_v5 = vrot.slane %v689_v1, 5  ;;  %v431_v18 = vld [vmem:[%s4515_s17 + $0x3c] sm:$0xf]  ;;  %3878 = vmatprep.subr.bf16.mxu1 %v4164_v14 }
  0x3a   : > { %3816 = vmatprep.subr.bf16.mxu0 %v4152_v53  ;;  %v532_v28 = vor.u32 %v531_v21, %v527_v20  ;;  %v749_v31 = vrot.slane %v685_v26, 5  ;;  %v757_v11 = vsel %vm4529_vm4, %v3386_v3, %v756_v4  ;;  %v758_v12 = vrot.slane %v756_v4, 4  ;;  %v4165_v17 = vld [vmem:[%s5270_s1 + $0x188] sm:$0xff]   ;;  %v432_v21 = vld [vmem:[%s4515_s17 + $0x40] sm:$0xf]  ;;  %v4173_v3 = vld [vmem:[%s4515_s17 + $0x54] sm:$0xff]   ;;  %p4224_p6 = pnand %p4223_p5, %p4217_p1 }
  0x3b   : > { %v523_v33 = vrot.slane %v522_v24, 4  ;;  %v567_v24 = vshll.u32 %v431_v18, 16  ;;  %v577_v26 = vshrl.u32 %v432_v21, 16  ;;  %v695_v14 = vld [vmem:[%s4515_s17 + $0x50] sm:$0x1] }
  0x3c   : > { %2463 = vmatmul.mubr.bf16.gmra.mrb[4].mxu0 %v4147_v30  ;;  %v3385_v30 = vrot.slane %v684_v25, 9  ;;  %v533_v35 = vrot.slane %v532_v28, 4  ;;  %v751_v38 = vrot.slane %v749_v31, 4  ;;  %3879 = vmatpush3.bf16.msra.mxu1 %v4165_v17  ;;  %v573_v25 = vshll.u32 %v432_v21, 16  ;;  %v4166_v28 = vld [vmem:[%s4515_s17 + $0x48] sm:$0xff]   ;;  %v4176_v21 = vld [vmem:[%s5270_s1 + $0x170] sm:$0xff]  }
  0x3d   : > { %2560 = vmatmul.mubr.bf16.gmra.mrb[4].mxu1 %v3391_v44  ;;  %3817 = vmatpush3.bf16.msra.mxu0 %v4153_v62  ;;  %v528_v39 = vsel %vm4538_vm5, %v523_v33, %v527_v20  ;;  %v428_v44 = vld [vmem:[%s4515_s17 + $0x30] sm:$0xf]  ;;  %v585_v33 = vrot.slane %v583_v27, 5  ;;  %v4178_v27 = vld [vmem:[%s5270_s1 + $0x1e0] sm:$0xff]  }
  0x3e   : > { %2567 = vmatprep.mubr.bf16.mxu1 %v4150_v48  ;;  %2470 = vmatprep.mubr.bf16.mxu0 %v3376_v15  ;;  %v750_v37 = vsel %vm4529_vm4, %v3385_v30, %v749_v31  ;;  %v538_v41 = vsel %vm4538_vm5, %v533_v35, %v537_v29  ;;  %v753_v42 = vsel %vm4529_vm4, %v751_v38, %v752_v34  ;;  %v429_v48 = vld [vmem:[%s4515_s17 + $0x34] sm:$0xf]  ;;  %v540_v50 = vshrl.u32 %v428_v44, 16  ;;  %v690_v35 = vld [vmem:[%s4515_s17 + $0x3c] sm:$0xe] }
  0x3f   : > { %3818 = vmatprep.subr.bf16.mxu0 %v4156_v23  ;;  %v3377_v45 = vcombine.low %v528_v39, %v538_v41  ;;  %v3393_v47 = vcombine.low %v750_v37, %v753_v42  ;;  %v543_v52 = vshll.u32 %v428_v44, 16  ;;  %v549_v53 = vshll.u32 %v429_v48, 16  ;;  %v692_v37 = vld [vmem:[%s4515_s17 + $0x44] sm:$0x1]  ;;  %v4168_v42 = vld [vmem:[%s5270_s1 + $0x168] sm:$0xff]  }
  0x40   : > { %v553_v54 = vshrl.u32 %v429_v48, 16  ;;  %v542_v57 = vrot.slane %v540_v50, 4  ;;  %v564_v23 = vshrl.u32 %v431_v18, 16  ;;  %v569_v30 = vrot.slane %v567_v24, 5  ;;  %v4169_v44 = vld [vmem:[%s5270_s1 + $0x128] sm:$0xff]  }
  0x41   : > { %3819 = vmatpush3.bf16.msra.mxu0 %v4157_v32  ;;  %v545_v58 = vrot.slane %v543_v52, 5  ;;  %v551_v59 = vrot.slane %v549_v53, 5  ;;  %v575_v31 = vrot.slane %v573_v25, 5  ;;  %v579_v32 = vrot.slane %v577_v26, 4  ;;  %v4170_v52 = vld [vmem:[%s5270_s1 + $0x1d0] sm:$0xff]  }
  0x42   : > { %v555_v60 = vrot.slane %v553_v54, 4  ;;  %3820 = vmatprep.subr.bf16.mxu0 %v4162_v6  ;;  %v566_v29 = vrot.slane %v564_v23, 4  ;;  %v3387_v39 = vrot.slane %v690_v35, 9  ;;  %v766_v41 = vrot.slane %v692_v37, 5  ;;  %3880 = vmatprep.subr.bf16.mxu1 %v4170_v52  ;;  %v4177_v25 = vld [vmem:[%s5270_s1 + $0x130] sm:$0xff]  }
  0x43   : > { %v546_v62 = vor.u32 %v545_v58, %v542_v57  ;;  %v580_v38 = vor.u32 %v579_v32, %v575_v31  ;;  %v4172_v58 = vld [vmem:[%s5270_s1 + $0x1d8] sm:$0xff]   ;;  %3881 = vmatpush3.bf16.msra.mxu1 %v4171_v55  ;;  %v773_v18 = vrot.slane %v695_v14, 5  ;;  %v4180_v32 = vld [vmem:[%s5270_s1 + $0x1e8] sm:$0xff]   ;;  %v696_v52 = vld [vmem:[%s4515_s17 + $0x54] sm:$0xe] }
  0x44   : > { %2471 = vmatmul.mubr.bf16.gmra.mrb[8].mxu0 %v4151_v2  ;;  %v556_v2 = vor.u32 %v555_v60, %v551_v59  ;;  %v570_v34 = vor.u32 %v569_v30, %v566_v29  ;;  %v435_v60 = vld [vmem:[%s4515_s17 + $0x4c] sm:$0xf]  ;;  %3882 = vmatprep.subr.bf16.mxu1 %v4172_v58  ;;  %v4179_v30 = vld [vmem:[%s5270_s1 + $0x1a0] sm:$0xff]   ;;  %v439_v35 = vld [vmem:[%s4515_s17 + $0x5c] sm:$0x1] }
  0x45   : > { %2568 = vmatmul.mubr.bf16.gmra.mrb[8].mxu1 %v3392_v16  ;;  %2478 = vmatprep.mubr.bf16.mxu0 %v3377_v45  ;;  %v547_v7 = vrot.slane %v546_v62, 4  ;;  %v760_v16 = vsel %vm4529_vm4, %v758_v12, %v759_v5  ;;  %v581_v45 = vrot.slane %v580_v38, 4  ;;  %v597_v0 = vshll.u32 %v435_v60, 16  ;;  %v693_v12 = vld [vmem:[%s4515_s17 + $0x48] sm:$0xe] }
  0x46   : > { %2575 = vmatprep.mubr.bf16.mxu1 %v4154_v19  ;;  %v557_v9 = vrot.slane %v556_v2, 4  ;;  %3821 = vmatpush3.bf16.msra.mxu0 %v4163_v8  ;;  %v3394_v20 = vcombine.low %v757_v11, %v760_v16  ;;  %v571_v43 = vrot.slane %v570_v34, 4  ;;  %v601_v1 = vshrl.u32 %v435_v60, 16  ;;  %v4174_v8 = vld [vmem:[%s5270_s1 + $0x198] sm:$0xff]  }
  0x47   : > { %v552_v13 = vsel %vm4538_vm5, %v547_v7, %v551_v59  ;;  %3822 = vmatprep.subr.bf16.mxu0 %v4168_v42  ;;  %v586_v53 = vsel %vm4538_vm5, %v581_v45, %v585_v33  ;;  %v434_v59 = vld [vmem:[%s4515_s17 + $0x48] sm:$0xf]  ;;  %v599_v6 = vrot.slane %v597_v0, 5  ;;  %3883 = vmatpush3.bf16.msra.mxu1 %v4174_v8  ;;  %v3388_v16 = vrot.slane %v693_v12, 9  ;;  %v437_v33 = vld [vmem:[%s4515_s17 + $0x54] sm:$0xf] }
  0x48   : > { %v562_v15 = vsel %vm4538_vm5, %v557_v9, %v561_v61  ;;  %v576_v50 = vsel %vm4538_vm5, %v571_v43, %v575_v31  ;;  %v436_v61 = vld [vmem:[%s4515_s17 + $0x50] sm:$0x1]  ;;  %v588_v62 = vshrl.u32 %v434_v59, 16  ;;  %v591_v63 = vshll.u32 %v434_v59, 16  ;;  %3884 = vmatprep.subr.bf16.mxu1 %v4178_v27  ;;  %v438_v34 = vld [vmem:[%s4515_s17 + $0x58] sm:$0xf] }
  0x49   : > { %v3378_v19 = vcombine.low %v552_v13, %v562_v15  ;;  %v607_v2 = vshll.u32 %v436_v61, 16  ;;  %v603_v7 = vrot.slane %v601_v1, 4  ;;  %v694_v13 = vld [vmem:[%s4515_s17 + $0x4c] sm:$0xf]  ;;  %v615_v37 = vshll.u32 %v437_v33, 16  ;;  %v4183_v60 = vld [vmem:[%s4515_s17 + $0x54] sm:$0xff]  }
  0x4a   : > { %3823 = vmatpush3.bf16.msra.mxu0 %v4169_v44  ;;  %v590_v4 = vrot.slane %v588_v62, 4  ;;  %v593_v5 = vrot.slane %v591_v63, 5  ;;  %v770_v17 = vrot.slane %v694_v13, 5  ;;  %v621_v38 = vshll.u32 %v438_v34, 16  ;;  %v4184_v61 = vld [vmem:[%s5270_s1 + $0x178] sm:$0xff]  }
  0x4b   : > { %v604_v11 = vor.u32 %v603_v7, %v599_v6  ;;  %3824 = vmatprep.subr.bf16.mxu0 %v4176_v21  ;;  %3885 = vmatpush3.bf16.msra.mxu1 %v4179_v30  ;;  %v617_v43 = vrot.slane %v615_v37, 5  ;;  %v4185_v1 = vld [vmem:[%s5270_s1 + $0x138] sm:$0xff]  }
  0x4c   : > { %2479 = vmatmul.mubr.bf16.gmra.mrb[12].mxu0 %v4155_v36  ;;  %v691_v36 = vld [vmem:[%s4515_s17 + $0x40] sm:$0xf]  ;;  %v594_v9 = vor.u32 %v593_v5, %v590_v4  ;;  %v771_v23 = vsel %vm4529_vm4, %v3388_v16, %v770_v17  ;;  %v772_v24 = vrot.slane %v770_v17, 4  ;;  %3886 = vmatprep.subr.bf16.mxu1 %v4180_v32  ;;  %v623_v44 = vrot.slane %v621_v38, 5  ;;  %v4188_v8 = vld [vmem:[%s5270_s1 + $0x1f8] sm:$0xff]  }
  0x4d   : > { %2576 = vmatmul.mubr.bf16.gmra.mrb[12].mxu1 %v3393_v47  ;;  %2486 = vmatprep.mubr.bf16.mxu0 %v3378_v19  ;;  %v763_v40 = vrot.slane %v691_v36, 5  ;;  %v4167_v47 = vld [vmem:[%s4515_s17 + $0x3c] sm:$0xff]   ;;  %v605_v19 = vrot.slane %v604_v11, 4  ;;  %v612_v36 = vshrl.u32 %v437_v33, 16  ;;  %v3458_v11 = vld [vmem:[%s4515_s17 + $0x14] sm:$0x1] }
  0x4e   : > { %2583 = vmatprep.mubr.bf16.mxu1 %v4160_v56  ;;  %v3379_v56 = vcombine.low %v576_v50, %v586_v53  ;;  %v595_v15 = vrot.slane %v594_v9, 4  ;;  %v774_v29 = vsel %vm4529_vm4, %v772_v24, %v773_v18  ;;  %3825 = vmatpush3.bf16.msra.mxu0 %v4177_v25  ;;  %v697_v53 = vld [vmem:[%s4515_s17 + $0x58] sm:$0xf]  ;;  %v3456_v9 = vld [vmem:[%s4515_s17 + $0xc] sm:$0xe] }
  0x4f   : > { %v764_v48 = vsel %vm4529_vm4, %v3387_v39, %v763_v40  ;;  %v765_v49 = vrot.slane %v763_v40, 4  ;;  %v3396_v31 = vcombine.low %v771_v23, %v774_v29  ;;  %v625_v39 = vshrl.u32 %v438_v34, 16  ;;  %3826 = vmatprep.subr.bf16.mxu0 %v4184_v61  ;;  %v4189_v13 = vld [vmem:[%s5270_s1 + $0x1b8] sm:$0xff]   ;;  %v3424_v16 = vld [vmem:[%s4515_s17 + $0xc] sm:$0xf]  ;;  %v4770_v23 = vld [vmem:[%s5270_s1 + $0x200] sm:$0xff]  }
  0x50   : > { %v600_v22 = vsel %vm4538_vm5, %v595_v15, %v599_v6  ;;  %v631_v40 = vshll.u32 %v439_v35, 16  ;;  %v614_v42 = vrot.slane %v612_v36, 4  ;;  %v4187_v6 = vld [vmem:[%s5270_s1 + $0x1b0] sm:$0xff]   ;;  %v3480_v12 = vrot.slane %v3456_v9, 9  ;;  %v3522_v30 = vld [vmem:[%s4515_s17 + $0x18] sm:$0xf] }
  0x51   : > { %v767_v54 = vsel %vm4529_vm4, %v765_v49, %v766_v41  ;;  %v4181_v41 = vld [vmem:[%s4515_s17 + $0x60] sm:$0xff]   ;;  %v627_v45 = vrot.slane %v625_v39, 4  ;;  %v1207_v15 = vrot.slane %v3458_v11, 5  ;;  %v3425_v17 = vld [vmem:[%s4515_s17 + $0x10] sm:$0xf]  ;;  %v923_v21 = vshrl.u32 %v3424_v16, 16 }
  0x52   : > { %v3395_v57 = vcombine.low %v764_v48, %v767_v54  ;;  %v618_v48 = vor.u32 %v617_v43, %v614_v42  ;;  %v633_v49 = vrot.slane %v631_v40, 5  ;;  %v698_v54 = vld [vmem:[%s4515_s17 + $0x5c] sm:$0x1]  ;;  %3827 = vmatpush3.bf16.msra.mxu0 %v4185_v1  ;;  %v3426_v18 = vld [vmem:[%s4515_s17 + $0x14] sm:$0x1]  ;;  %v932_v24 = vshll.u32 %v3425_v17, 16 }
  0x53   : > { %v628_v50 = vor.u32 %v627_v45, %v623_v44  ;;  %v780_v58 = vrot.slane %v698_v54, 5  ;;  %v936_v25 = vshrl.u32 %v3425_v17, 16  ;;  %3972 = vmatprep.subr.bf16.mxu0 %v4770_v23  ;;  %v3524_v36 = vld [vmem:[%s4515_s17 + $0x20] sm:$0x1]  ;;  %v1399_v38 = vshrl.u32 %v3522_v30, 16 }
  0x54   : > { %2487 = vmatmul.mubr.bf16.gmra.mrb[16].mxu0 %v4161_v10  ;;  %v609_v10 = vrot.slane %v607_v2, 5  ;;  %v619_v55 = vrot.slane %v618_v48, 4  ;;  %v934_v33 = vrot.slane %v932_v24, 5  ;;  %v1402_v39 = vshll.u32 %v3522_v30, 16  ;;  %v3427_v61 = vld [vmem:[%s4515_s17 + $0x18] sm:$0xf] }
  0x55   : > { %2584 = vmatmul.mubr.bf16.gmra.mrb[16].mxu1 %v3394_v20  ;;  %2494 = vmatprep.mubr.bf16.mxu0 %v3379_v56  ;;  %v4175_v20 = vld [vmem:[%s4515_s17 + $0x48] sm:$0xff]   ;;  %v3389_v56 = vrot.slane %v696_v52, 9  ;;  %v629_v59 = vrot.slane %v628_v50, 4  ;;  %v938_v34 = vrot.slane %v936_v25, 4  ;;  %v1418_v43 = vshll.u32 %v3524_v36, 16 }
  0x56   : > { %2591 = vmatprep.mubr.bf16.mxu1 %v4166_v28  ;;  %v610_v26 = vsel %vm4538_vm5, %v605_v19, %v609_v10  ;;  %v624_v62 = vsel %vm4538_vm5, %v619_v55, %v623_v44  ;;  %v3457_v10 = vld [vmem:[%s4515_s17 + $0x10] sm:$0xf]  ;;  %v3459_v44 = vld [vmem:[%s4515_s17 + $0x18] sm:$0xe]  ;;  %v1404_v48 = vrot.slane %v1402_v39, 5 }
  0x57   : > { %v3380_v28 = vcombine.low %v600_v22, %v610_v26  ;;  %v634_v2 = vsel %vm4538_vm5, %v629_v59, %v633_v49  ;;  %v1204_v14 = vrot.slane %v3457_v10, 5  ;;  %v926_v22 = vshll.u32 %v3424_v16, 16  ;;  %v3460_v50 = vld [vmem:[%s4515_s17 + $0x1c] sm:$0xf]  ;;  %v3461_v55 = vld [vmem:[%s4515_s17 + $0x20] sm:$0x1] }
  0x58   : > { %v3381_v4 = vcombine.low %v624_v62, %v634_v2  ;;  %v942_v26 = vshll.u32 %v3426_v18, 16  ;;  %v1420_v54 = vrot.slane %v1418_v43, 5  ;;  %v1211_v59 = vrot.slane %v3460_v50, 5  ;;  %v3428_v62 = vld [vmem:[%s4515_s17 + $0x1c] sm:$0xf] }
  0x59   : > { %v1205_v19 = vsel %vm4529_vm4, %v3480_v12, %v1204_v14  ;;  %v928_v29 = vrot.slane %v926_v22, 5  ;;  %v3429_v2 = vld [vmem:[%s4515_s17 + $0x20] sm:$0x1]  ;;  %v3525_v9 = vld [vmem:[%s4515_s17 + $0x24] sm:$0xf]  ;;  %v960_v17 = vshrl.u32 %v3428_v62, 16 }
  0x5a   : > { %v944_v35 = vrot.slane %v942_v26, 5  ;;  %v966_v18 = vshll.u32 %v3429_v2, 16  ;;  %v3462_v26 = vld [vmem:[%s4515_s17 + $0x24] sm:$0xe]  ;;  %v1423_v30 = vshrl.u32 %v3525_v9, 16 }
  0x5b   : > { %v3464_v36 = vld [vmem:[%s4515_s17 + $0x2c] sm:$0x1] }
  0x5c   : > { %2495 = vmatmul.mubr.bf16.gmra.mrb[20].mxu0 %v4167_v47  ;;  %v4182_v47 = vld [vmem:[%s5270_s1 + $0x1a8] sm:$0xff]  }
  0x5d   : > { %2592 = vmatmul.mubr.bf16.gmra.mrb[20].mxu1 %v3395_v57  ;;  %2502 = vmatprep.mubr.bf16.mxu0 %v3380_v28  ;;  %v777_v57 = vrot.slane %v697_v53, 5  ;;  %v925_v28 = vrot.slane %v923_v21, 4  ;;  %v4191_v21 = vld [vmem:[%s4515_s17 + $0x18] sm:$0xff]  }
  0x5e   : > { %2599 = vmatprep.mubr.bf16.mxu1 %v4173_v3  ;;  %3887 = vmatpush3.bf16.msra.mxu1 %v4182_v47  ;;  %v4186_v3 = vld [vmem:[%s5270_s1 + $0x1f0] sm:$0xff]   ;;  %v1401_v47 = vrot.slane %v1399_v38, 4  ;;  %v1425_v38 = vrot.slane %v1423_v30, 4 }
  0x5f   : > { %v778_v63 = vsel %vm4529_vm4, %v3389_v56, %v777_v57  ;;  %v779_v0 = vrot.slane %v777_v57, 4  ;;  %3888 = vmatprep.subr.bf16.mxu1 %v4186_v3  ;;  %v929_v37 = vor.u32 %v928_v29, %v925_v28  ;;  %v3481_v56 = vrot.slane %v3459_v44, 9 }
  0x60   : > { %v947_v3 = vshrl.u32 %v3427_v61, 16  ;;  %v962_v28 = vrot.slane %v960_v17, 4  ;;  %v968_v29 = vrot.slane %v966_v18, 5 }
  0x61   : > { %v781_v5 = vsel %vm4529_vm4, %v779_v0, %v780_v58  ;;  %v930_v45 = vrot.slane %v929_v37, 4  ;;  %v1405_v58 = vor.u32 %v1404_v48, %v1401_v47  ;;  %v3431_v47 = vld [vmem:[%s4515_s17 + $0x28] sm:$0xf] }
  0x62   : > { %v3397_v7 = vcombine.low %v778_v63, %v781_v5  ;;  %3889 = vmatpush3.bf16.msra.mxu1 %v4187_v6  ;;  %v4192_v63 = vld [vmem:[%s5270_s1 + $0x208] sm:$0xff]   ;;  %v949_v11 = vrot.slane %v947_v3, 4 }
  0x63   : > { %3890 = vmatprep.subr.bf16.mxu1 %v4188_v8  ;;  %v935_v57 = vsel %vm4538_vm5, %v930_v45, %v934_v33  ;;  %v1406_v6 = vrot.slane %v1405_v58, 4  ;;  %v1213_v8 = vrot.slane %v1211_v59, 4 }
  0x64   : > { %2503 = vmatmul.mubr.bf16.gmra.mrb[24].mxu0 %v4175_v20  ;;  %v1206_v20 = vrot.slane %v1204_v14, 4  ;;  %v3526_v14 = vld [vmem:[%s4515_s17 + $0x28] sm:$0xf] }
  0x65   : > { %2600 = vmatmul.mubr.bf16.gmra.mrb[24].mxu1 %v3396_v31  ;;  %2510 = vmatprep.mubr.bf16.mxu0 %v3381_v4  ;;  %v3523_v31 = vld [vmem:[%s4515_s17 + $0x1c] sm:$0xf]  ;;  %v950_v4 = vshll.u32 %v3427_v61, 16  ;;  %v3432_v61 = vld [vmem:[%s4515_s17 + $0x2c] sm:$0x1] }
  0x66   : > { %2607 = vmatprep.mubr.bf16.mxu1 %v4181_v41  ;;  %3891 = vmatpush3.bf16.msra.mxu1 %v4189_v13  ;;  %v1208_v27 = vsel %vm4529_vm4, %v1206_v20, %v1207_v15  ;;  %v1408_v40 = vshll.u32 %v3523_v31, 16  ;;  %v939_v41 = vor.u32 %v938_v34, %v934_v33  ;;  %v1412_v42 = vshrl.u32 %v3523_v31, 16  ;;  %v3463_v31 = vld [vmem:[%s4515_s17 + $0x28] sm:$0xf] }
  0x67   : > { %v3488_v32 = vcombine.low %v1205_v19, %v1208_v27  ;;  %v952_v12 = vrot.slane %v950_v4, 5  ;;  %v956_v13 = vshll.u32 %v3428_v62, 16  ;;  %v3527_v19 = vld [vmem:[%s4515_s17 + $0x2c] sm:$0x1]  ;;  %v1432_v34 = vshll.u32 %v3526_v14, 16 }
  0x68   : > { %v1410_v49 = vrot.slane %v1408_v40, 5  ;;  %v940_v52 = vrot.slane %v939_v41, 4  ;;  %v1414_v53 = vrot.slane %v1412_v42, 4  ;;  %v1442_v39 = vshll.u32 %v3527_v19, 16  ;;  %v3430_v41 = vld [vmem:[%s4515_s17 + $0x24] sm:$0xf] }
  0x69   : > { %v953_v24 = vor.u32 %v952_v12, %v949_v11  ;;  %v958_v25 = vrot.slane %v956_v13, 5  ;;  %v3482_v40 = vrot.slane %v3462_v26, 9  ;;  %v1434_v44 = vrot.slane %v1432_v34, 5  ;;  %v3529_v4 = vld [vmem:[%s4515_s17 + $0x34] sm:$0xf]  ;;  %v4193_v12 = vld [vmem:[%s4515_s17 + $0x24] sm:$0xff]  }
  0x6a   : > { %v945_v0 = vsel %vm4538_vm5, %v940_v52, %v944_v35  ;;  %v1415_v1 = vor.u32 %v1414_v53, %v1410_v49  ;;  %v1411_v15 = vsel %vm4538_vm5, %v1406_v6, %v1410_v49  ;;  %v1436_v35 = vshrl.u32 %v3526_v14, 16  ;;  %v4196_v53 = vld [vmem:[%s5270_s1 + $0x218] sm:$0xff]  }
  0x6b   : > { %v3448_v5 = vcombine.low %v935_v57, %v945_v0  ;;  %v954_v33 = vrot.slane %v953_v24, 4  ;;  %v963_v37 = vor.u32 %v962_v28, %v958_v25  ;;  %v1444_v49 = vrot.slane %v1442_v39, 5 }
  0x6c   : > { %2511 = vmatmul.mubr.bf16.gmra.mrb[28].mxu0 %v4183_v60  ;;  %v1214_v60 = vrot.slane %v3461_v55, 5  ;;  %v1416_v10 = vrot.slane %v1415_v1, 4  ;;  %v1438_v45 = vrot.slane %v1436_v35, 4  ;;  %v1218_v50 = vrot.slane %v3463_v31, 5 }
  0x6d   : > { %2608 = vmatmul.mubr.bf16.gmra.mrb[28].mxu1 %v3397_v7  ;;  %2648 = vmatprep.mubr.bf16.mxu0 %v3488_v32  ;;  %v1212_v7 = vsel %vm4529_vm4, %v3481_v56, %v1211_v59  ;;  %v4194_v32 = vld [vmem:[%s5270_s1 + $0x210] sm:$0xff]   ;;  %v959_v42 = vsel %vm4538_vm5, %v954_v33, %v958_v25  ;;  %v964_v48 = vrot.slane %v963_v37, 4  ;;  %v1221_v52 = vrot.slane %v3464_v36, 5  ;;  %v4200_v33 = vld [vmem:[%s5270_s1 + $0x228] sm:$0xff]  }
  0x6e   : > { %v1215_v16 = vsel %vm4529_vm4, %v1213_v8, %v1214_v60  ;;  %v1421_v20 = vsel %vm4538_vm5, %v1416_v10, %v1420_v54  ;;  %v1439_v55 = vor.u32 %v1438_v45, %v1434_v44  ;;  %v971_v56 = vshrl.u32 %v3430_v41, 16  ;;  %v3434_v37 = vld [vmem:[%s4515_s17 + $0x34] sm:$0xf]  ;;  %v3435_v45 = vld [vmem:[%s4515_s17 + $0x38] sm:$0x1] }
  0x6f   : > { %v3489_v22 = vcombine.low %v1212_v7, %v1215_v16  ;;  %v3546_v27 = vcombine.low %v1411_v15, %v1421_v20  ;;  %v974_v57 = vshll.u32 %v3430_v41, 16  ;;  %v969_v58 = vsel %vm4538_vm5, %v964_v48, %v968_v29  ;;  %v3530_v15 = vld [vmem:[%s4515_s17 + $0x38] sm:$0x1]  ;;  %v3465_v20 = vld [vmem:[%s4515_s17 + $0x30] sm:$0xe] }
  0x70   : > { %v1219_v59 = vsel %vm4529_vm4, %v3482_v40, %v1218_v50  ;;  %v1220_v60 = vrot.slane %v1218_v50, 4  ;;  %v980_v62 = vshll.u32 %v3431_v47, 16  ;;  %v3449_v0 = vcombine.low %v959_v42, %v969_v58 }
  0x71   : > { %2745 = vmatprep.mubr.bf16.mxu1 %v3546_v27  ;;  %v1440_v2 = vrot.slane %v1439_v55, 4  ;;  %v973_v3 = vrot.slane %v971_v56, 4  ;;  %v976_v6 = vrot.slane %v974_v57, 5  ;;  %v984_v8 = vshrl.u32 %v3431_v47, 16  ;;  %v3467_v27 = vld [vmem:[%s4515_s17 + $0x38] sm:$0x1] }
  0x72   : > { %v982_v7 = vrot.slane %v980_v62, 5  ;;  %v990_v14 = vshll.u32 %v3432_v61, 16  ;;  %v1456_v25 = vshll.u32 %v3529_v4, 16  ;;  %v1460_v26 = vshrl.u32 %v3529_v4, 16 }
  0x73   : > { %v1445_v11 = vsel %vm4538_vm5, %v1440_v2, %v1444_v49  ;;  %v977_v17 = vor.u32 %v976_v6, %v973_v3  ;;  %v986_v18 = vrot.slane %v984_v8, 4  ;;  %v1466_v31 = vshll.u32 %v3530_v15, 16  ;;  %v3468_v6 = vld [vmem:[%s4515_s17 + $0x3c] sm:$0xe] }
  0x74   : > { %2649 = vmatmul.mubr.bf16.vlgmr.msra.gmra.mrb[32].mxu0 %v3448_v5  ;;  %v1222_v5 = vsel %vm4529_vm4, %v1220_v60, %v1221_v52  ;;  %v1458_v34 = vrot.slane %v1456_v25, 5  ;;  %v1462_v35 = vrot.slane %v1460_v26, 4  ;;  %v3483_v36 = vrot.slane %v3465_v20, 9  ;;  %v4195_v60 = vld [vmem:[%s4515_s17 + $0x30] sm:$0xff]  }
  0x75   : > { %3973 = vmatpush3.bf16.msra.mxu0 %v4770_v23  ;;  %2656 = vmatprep.mubr.bf16.mxu0 %v3489_v22  ;;  %v1426_v23 = vshll.u32 %v3525_v9, 16  ;;  %v4198_v9 = vld [vmem:[%s5270_s1 + $0x220] sm:$0xff]   ;;  %v3490_v13 = vcombine.low %v1219_v59, %v1222_v5  ;;  %v992_v22 = vrot.slane %v990_v14, 5  ;;  %v978_v28 = vrot.slane %v977_v17, 4  ;;  %v4202_v59 = vld [vmem:[%s5270_s1 + $0x230] sm:$0xff]  }
  0x76   : > { %3974 = vmatprep.subr.bf16.mxu0 %v4192_v63  ;;  %2746 = vmatmul.mubr.bf16.vlgmr.msra.gmra.mrb[32].mxu1 %v4191_v21  ;;  %v3466_v21 = vld [vmem:[%s4515_s17 + $0x34] sm:$0xf]  ;;  %v987_v29 = vor.u32 %v986_v18, %v982_v7  ;;  %v1468_v40 = vrot.slane %v1466_v31, 5  ;;  %v1014_v4 = vshll.u32 %v3435_v45, 16  ;;  %v3533_v5 = vld [vmem:[%s4515_s17 + $0x44] sm:$0x1] }
  0x77   : > { %v1428_v43 = vrot.slane %v1426_v23, 5  ;;  %v1225_v41 = vrot.slane %v3466_v21, 5  ;;  %v3436_v18 = vld [vmem:[%s4515_s17 + $0x3c] sm:$0xf] }
  0x78   : > { %v988_v39 = vrot.slane %v987_v29, 4  ;;  %v1016_v14 = vrot.slane %v1014_v4, 5 }
  0x79   : > { %3975 = vmatpush3.bf16.msra.mxu0 %v4192_v63  ;;  %v1429_v54 = vor.u32 %v1428_v43, %v1425_v38  ;;  %v3528_v63 = vld [vmem:[%s4515_s17 + $0x30] sm:$0xf]  ;;  %v983_v38 = vsel %vm4538_vm5, %v978_v28, %v982_v7  ;;  %v1463_v43 = vor.u32 %v1462_v35, %v1458_v34  ;;  %v1226_v49 = vsel %vm4529_vm4, %v3483_v36, %v1225_v41  ;;  %v4204_v7 = vld [vmem:[%s5270_s1 + $0x238] sm:$0xff]  }
  0x7a   : > { %3976 = vmatprep.subr.bf16.mxu0 %v4194_v32  ;;  %v1447_v19 = vshrl.u32 %v3528_v63, 16  ;;  %v1450_v24 = vshll.u32 %v3528_v63, 16  ;;  %v993_v48 = vsel %vm4538_vm5, %v988_v39, %v992_v22  ;;  %v1227_v50 = vrot.slane %v1225_v41, 4  ;;  %v3534_v41 = vld [vmem:[%s4515_s17 + $0x48] sm:$0xf] }
  0x7b   : > { %v1430_v1 = vrot.slane %v1429_v54, 4  ;;  %v3532_v54 = vld [vmem:[%s4515_s17 + $0x40] sm:$0xf]  ;;  %v3450_v55 = vcombine.low %v983_v38, %v993_v48  ;;  %v1464_v57 = vrot.slane %v1463_v43, 4  ;;  %v1004_v63 = vshll.u32 %v3434_v37, 16 }
  0x7c   : > { %2657 = vmatmul.mubr.bf16.gmra.mrb[36].mxu0 %v3449_v0  ;;  %v1449_v30 = vrot.slane %v1447_v19, 4  ;;  %v1452_v23 = vrot.slane %v1450_v24, 5  ;;  %v1008_v0 = vshrl.u32 %v3434_v37, 16  ;;  %v1480_v17 = vshll.u32 %v3532_v54, 16  ;;  %v3437_v24 = vld [vmem:[%s4515_s17 + $0x40] sm:$0xf] }
  0x7d   : > { %3977 = vmatpush3.bf16.msra.mxu0 %v4194_v32  ;;  %v1435_v10 = vsel %vm4538_vm5, %v1430_v1, %v1434_v44  ;;  %2664 = vmatprep.mubr.bf16.mxu0 %v3490_v13  ;;  %v3433_v32 = vld [vmem:[%s4515_s17 + $0x30] sm:$0xf]  ;;  %v1228_v44 = vrot.slane %v3467_v27, 5  ;;  %v1469_v2 = vsel %vm4538_vm5, %v1464_v57, %v1468_v40  ;;  %v3470_v13 = vld [vmem:[%s4515_s17 + $0x44] sm:$0x1]  ;;  %v1484_v21 = vshrl.u32 %v3532_v54, 16 }
  0x7e   : > { %3978 = vmatprep.subr.bf16.mxu0 %v4196_v53  ;;  %v3547_v16 = vcombine.low %v1435_v10, %v1445_v11  ;;  %v1453_v42 = vor.u32 %v1452_v23, %v1449_v30  ;;  %v995_v47 = vshrl.u32 %v3433_v32, 16  ;;  %v998_v52 = vshll.u32 %v3433_v32, 16  ;;  %v3438_v38 = vld [vmem:[%s4515_s17 + $0x44] sm:$0x1]  ;;  %v3536_v57 = vld [vmem:[%s4515_s17 + $0x50] sm:$0x1] }
  0x7f   : > { %v1229_v61 = vsel %vm4529_vm4, %v1227_v50, %v1228_v44  ;;  %v1006_v10 = vrot.slane %v1004_v63, 5  ;;  %v1010_v11 = vrot.slane %v1008_v0, 4  ;;  %v1490_v22 = vshll.u32 %v3533_v5, 16  ;;  %v3472_v0 = vld [vmem:[%s4515_s17 + $0x4c] sm:$0xf] }
  0x80   : > { %2753 = vmatprep.mubr.bf16.mxu1 %v3547_v16  ;;  %v1454_v56 = vrot.slane %v1453_v42, 4  ;;  %v997_v58 = vrot.slane %v995_v47, 4  ;;  %v1000_v62 = vrot.slane %v998_v52, 5  ;;  %v3491_v3 = vcombine.low %v1226_v49, %v1229_v61  ;;  %v3535_v52 = vld [vmem:[%s4515_s17 + $0x4c] sm:$0xf] }
  0x81   : > { %3979 = vmatpush3.bf16.msra.mxu0 %v4196_v53  ;;  %2754 = vmatmul.mubr.bf16.gmra.mrb[36].mxu1 %v4193_v12  ;;  %v3531_v53 = vld [vmem:[%s4515_s17 + $0x3c] sm:$0xf]  ;;  %v3469_v12 = vld [vmem:[%s4515_s17 + $0x40] sm:$0xf]  ;;  %v1011_v20 = vor.u32 %v1010_v11, %v1006_v10  ;;  %v1482_v27 = vrot.slane %v1480_v17, 5  ;;  %v3484_v28 = vrot.slane %v3468_v6, 9 }
  0x82   : > { %3980 = vmatprep.subr.bf16.mxu0 %v4198_v9  ;;  %v1459_v1 = vsel %vm4538_vm5, %v1454_v56, %v1458_v34  ;;  %v1471_v15 = vshrl.u32 %v3531_v53, 16  ;;  %v1474_v16 = vshll.u32 %v3531_v53, 16  ;;  %v1486_v31 = vrot.slane %v1484_v21, 4  ;;  %v3439_v6 = vld [vmem:[%s4515_s17 + $0x48] sm:$0xf] }
  0x83   : > { %v3548_v8 = vcombine.low %v1459_v1, %v1469_v2  ;;  %v1012_v30 = vrot.slane %v1011_v20, 4  ;;  %v1492_v32 = vrot.slane %v1490_v22, 5  ;;  %v1232_v23 = vrot.slane %v3469_v12, 5  ;;  %v3473_v1 = vld [vmem:[%s4515_s17 + $0x50] sm:$0x1] }
  0x84   : > { %2665 = vmatmul.mubr.bf16.gmra.mrb[40].mxu0 %v3450_v55  ;;  %v1473_v25 = vrot.slane %v1471_v15, 4  ;;  %v1476_v26 = vrot.slane %v1474_v16, 5  ;;  %v1235_v34 = vrot.slane %v3470_v13, 5  ;;  %v1019_v35 = vshrl.u32 %v3436_v18, 16 }
  0x85   : > { %3981 = vmatpush3.bf16.msra.mxu0 %v4198_v9  ;;  %v1001_v9 = vor.u32 %v1000_v62, %v997_v58  ;;  %2672 = vmatprep.mubr.bf16.mxu0 %v3491_v3  ;;  %v1017_v36 = vsel %vm4538_vm5, %v1012_v30, %v1016_v14  ;;  %v1487_v37 = vor.u32 %v1486_v31, %v1482_v27  ;;  %v1022_v39 = vshll.u32 %v3436_v18, 16  ;;  %v3471_v58 = vld [vmem:[%s4515_s17 + $0x48] sm:$0xe]  ;;  %v3537_v30 = vld [vmem:[%s4515_s17 + $0x54] sm:$0xf] }
  0x86   : > { %3982 = vmatprep.subr.bf16.mxu0 %v4200_v33  ;;  %2761 = vmatprep.mubr.bf16.mxu1 %v3548_v8  ;;  %v1028_v40 = vshll.u32 %v3437_v24, 16  ;;  %v1233_v44 = vsel %vm4529_vm4, %v3484_v28, %v1232_v23  ;;  %v1234_v45 = vrot.slane %v1232_v23, 4  ;;  %v1021_v48 = vrot.slane %v1019_v35, 4 }
  0x87   : > { %v1002_v19 = vrot.slane %v1001_v9, 4  ;;  %v1488_v47 = vrot.slane %v1487_v37, 4  ;;  %v1024_v49 = vrot.slane %v1022_v39, 5  ;;  %v1032_v55 = vshrl.u32 %v3437_v24, 16 }
  0x88   : > { %v1030_v50 = vrot.slane %v1028_v40, 5  ;;  %v1236_v54 = vsel %vm4529_vm4, %v1234_v45, %v1235_v34  ;;  %v1038_v56 = vshll.u32 %v3438_v38, 16  ;;  %v1495_v63 = vshrl.u32 %v3534_v41, 16  ;;  %v3538_v38 = vld [vmem:[%s4515_s17 + $0x58] sm:$0xf] }
  0x89   : > { %3983 = vmatpush3.bf16.msra.mxu0 %v4200_v33  ;;  %2762 = vmatmul.mubr.bf16.gmra.mrb[40].mxu1 %v4195_v60  ;;  %v1007_v29 = vsel %vm4538_vm5, %v1002_v19, %v1006_v10  ;;  %v1477_v33 = vor.u32 %v1476_v26, %v1473_v25  ;;  %v4197_v60 = vld [vmem:[%s4515_s17 + $0x3c] sm:$0xff]   ;;  %v3492_v61 = vcombine.low %v1233_v44, %v1236_v54  ;;  %v1034_v3 = vrot.slane %v1032_v55, 4  ;;  %v3440_v19 = vld [vmem:[%s4515_s17 + $0x4c] sm:$0xf]  ;;  %v3441_v25 = vld [vmem:[%s4515_s17 + $0x50] sm:$0x1] }
  0x8a   : > { %3984 = vmatprep.subr.bf16.mxu0 %v4202_v59  ;;  %v3451_v42 = vcombine.low %v1007_v29, %v1017_v36  ;;  %v1025_v62 = vor.u32 %v1024_v49, %v1021_v48  ;;  %v1040_v4 = vrot.slane %v1038_v56, 5  ;;  %v1498_v5 = vshll.u32 %v3534_v41, 16  ;;  %v3474_v44 = vld [vmem:[%s4515_s17 + $0x54] sm:$0xe] }
  0x8b   : > { %v1478_v43 = vrot.slane %v1477_v33, 4  ;;  %v1497_v8 = vrot.slane %v1495_v63, 4  ;;  %v1504_v9 = vshll.u32 %v3535_v52, 16  ;;  %v1508_v10 = vshrl.u32 %v3535_v52, 16  ;;  %v3475_v52 = vld [vmem:[%s4515_s17 + $0x58] sm:$0xf] }
  0x8c   : > { %2673 = vmatmul.mubr.bf16.gmra.mrb[44].mxu0 %v3451_v42  ;;  %v1035_v11 = vor.u32 %v1034_v3, %v1030_v50  ;;  %v1500_v12 = vrot.slane %v1498_v5, 5  ;;  %v1514_v13 = vshll.u32 %v3536_v57, 16  ;;  %v3485_v14 = vrot.slane %v3471_v58, 9  ;;  %v3476_v57 = vld [vmem:[%s4515_s17 + $0x5c] sm:$0x1] }
  0x8d   : > { %3985 = vmatpush3.bf16.msra.mxu0 %v4202_v59  ;;  %v1483_v53 = vsel %vm4538_vm5, %v1478_v43, %v1482_v27  ;;  %v1493_v59 = vsel %vm4538_vm5, %v1488_v47, %v1492_v32  ;;  %2680 = vmatprep.mubr.bf16.mxu0 %v3492_v61  ;;  %v1506_v16 = vrot.slane %v1504_v9, 5  ;;  %v1510_v17 = vrot.slane %v1508_v10, 4  ;;  %v3539_v43 = vld [vmem:[%s4515_s17 + $0x5c] sm:$0x1]  ;;  %v4199_v47 = vld [vmem:[%s4515_s17 + $0x48] sm:$0xff]  }
  0x8e   : > { %3986 = vmatprep.subr.bf16.mxu0 %v4204_v7  ;;  %v3549_v2 = vcombine.low %v1483_v53, %v1493_v59  ;;  %v1239_v18 = vrot.slane %v3472_v0, 5  ;;  %v1036_v20 = vrot.slane %v1035_v11, 4  ;;  %v1501_v21 = vor.u32 %v1500_v12, %v1497_v8 }
  0x8f   : > { %v1516_v22 = vrot.slane %v1514_v13, 5  ;;  %v1242_v24 = vrot.slane %v3473_v1, 5  ;;  %v1511_v26 = vor.u32 %v1510_v17, %v1506_v16  ;;  %v1043_v29 = vshrl.u32 %v3439_v6, 16 }
  0x90   : > { %2769 = vmatprep.mubr.bf16.mxu1 %v3549_v2  ;;  %v1240_v27 = vsel %vm4529_vm4, %v3485_v14, %v1239_v18  ;;  %v1241_v28 = vrot.slane %v1239_v18, 4  ;;  %v1041_v31 = vsel %vm4538_vm5, %v1036_v20, %v1040_v4  ;;  %v1502_v32 = vrot.slane %v1501_v21, 4  ;;  %v3442_v2 = vld [vmem:[%s4515_s17 + $0x54] sm:$0xf] }
  0x91   : > { %3987 = vmatpush3.bf16.msra.mxu0 %v4204_v7  ;;  %v1026_v7 = vrot.slane %v1025_v62, 4  ;;  %2770 = vmatmul.mubr.bf16.gmra.mrb[44].mxu1 %v4197_v60  ;;  %v1046_v33 = vshll.u32 %v3439_v6, 16  ;;  %v1052_v23 = vshll.u32 %v3440_v19, 16  ;;  %v1512_v35 = vrot.slane %v1511_v26, 4  ;;  %v3540_v26 = vld [vmem:[%s4515_s17 + $0x60] sm:$0xf] }
  0x92   : > { %v1243_v36 = vsel %vm4529_vm4, %v1241_v28, %v1242_v24  ;;  %v1045_v37 = vrot.slane %v1043_v29, 4  ;;  %v1507_v39 = vsel %vm4538_vm5, %v1502_v32, %v1506_v16  ;;  %v1056_v48 = vshrl.u32 %v3440_v19, 16  ;;  %v3444_v24 = vld [vmem:[%s4515_s17 + $0x5c] sm:$0x1]  ;;  %v3542_v32 = vld [vmem:[%s4515_s17 + $0x68] sm:$0x1] }
  0x93   : > { %v1031_v15 = vsel %vm4538_vm5, %v1026_v7, %v1030_v50  ;;  %v3493_v40 = vcombine.low %v1240_v27, %v1243_v36  ;;  %v1048_v41 = vrot.slane %v1046_v33, 5  ;;  %v1054_v42 = vrot.slane %v1052_v23, 5  ;;  %v3443_v7 = vld [vmem:[%s4515_s17 + $0x58] sm:$0xf] }
  0x94   : > { %v3452_v34 = vcombine.low %v1031_v15, %v1041_v31  ;;  %v1517_v45 = vsel %vm4538_vm5, %v1512_v35, %v1516_v22  ;;  %v1062_v49 = vshll.u32 %v3441_v25, 16  ;;  %v1519_v50 = vshrl.u32 %v3537_v30, 16  ;;  %v3541_v31 = vld [vmem:[%s4515_s17 + $0x64] sm:$0xf]  ;;  %v4201_v23 = vld [vmem:[%s4515_s17 + $0x54] sm:$0xff]  }
  0x95   : > { %v3550_v53 = vcombine.low %v1507_v39, %v1517_v45  ;;  %v1049_v54 = vor.u32 %v1048_v41, %v1045_v37  ;;  %v1522_v55 = vshll.u32 %v3537_v30, 16  ;;  %v1528_v56 = vshll.u32 %v3538_v38, 16  ;;  %v3477_v37 = vld [vmem:[%s4515_s17 + $0x60] sm:$0xe] }
  0x96   : > { %2681 = vmatmul.mubr.bf16.gmra.mrb[48].mxu0 %v3452_v34  ;;  %v1058_v58 = vrot.slane %v1056_v48, 4  ;;  %v1064_v59 = vrot.slane %v1062_v49, 5  ;;  %v1521_v60 = vrot.slane %v1519_v50, 4  ;;  %v1532_v61 = vshrl.u32 %v3538_v38, 16  ;;  %v3479_v48 = vld [vmem:[%s4515_s17 + $0x68] sm:$0x1] }
  0x97   : > { %2688 = vmatprep.mubr.bf16.mxu0 %v3493_v40  ;;  %2777 = vmatprep.mubr.bf16.mxu1 %v3550_v53  ;;  %v1050_v62 = vrot.slane %v1049_v54, 4  ;;  %v1524_v63 = vrot.slane %v1522_v55, 5  ;;  %v1530_v0 = vrot.slane %v1528_v56, 5  ;;  %v1538_v1 = vshll.u32 %v3539_v43, 16  ;;  %v3445_v54 = vld [vmem:[%s4515_s17 + $0x60] sm:$0xf] }
  0x98   : > { %v1059_v3 = vor.u32 %v1058_v58, %v1054_v42  ;;  %v1534_v4 = vrot.slane %v1532_v61, 4  ;;  %v3486_v5 = vrot.slane %v3474_v44, 9  ;;  %v1246_v6 = vrot.slane %v3475_v52, 5  ;;  %v3446_v55 = vld [vmem:[%s4515_s17 + $0x64] sm:$0xf] }
  0x99   : > { %2778 = vmatmul.mubr.bf16.gmra.mrb[48].mxu1 %v4199_v47  ;;  %v1055_v8 = vsel %vm4538_vm5, %v1050_v62, %v1054_v42  ;;  %v1525_v9 = vor.u32 %v1524_v63, %v1521_v60  ;;  %v1540_v10 = vrot.slane %v1538_v1, 5  ;;  %v1249_v11 = vrot.slane %v3476_v57, 5  ;;  %v3478_v47 = vld [vmem:[%s4515_s17 + $0x64] sm:$0xf] }
  0x9a   : > { %v1060_v12 = vrot.slane %v1059_v3, 4  ;;  %v1535_v13 = vor.u32 %v1534_v4, %v1530_v0  ;;  %v1247_v14 = vsel %vm4529_vm4, %v3486_v5, %v1246_v6  ;;  %v1248_v15 = vrot.slane %v1246_v6, 4  ;;  %v3447_v4 = vld [vmem:[%s4515_s17 + $0x68] sm:$0x1] }
  0x9b   : > { %v1526_v16 = vrot.slane %v1525_v9, 4  ;;  %v1067_v17 = vshrl.u32 %v3442_v2, 16  ;;  %v1070_v18 = vshll.u32 %v3442_v2, 16  ;;  %v1076_v19 = vshll.u32 %v3443_v7, 16 }
  0x9c   : > { %v1065_v20 = vsel %vm4538_vm5, %v1060_v12, %v1064_v59  ;;  %v1536_v21 = vrot.slane %v1535_v13, 4  ;;  %v1250_v22 = vsel %vm4529_vm4, %v1248_v15, %v1249_v11  ;;  %v1080_v25 = vshrl.u32 %v3443_v7, 16 }
  0x9d   : > { %v3453_v27 = vcombine.low %v1055_v8, %v1065_v20  ;;  %v1531_v28 = vsel %vm4538_vm5, %v1526_v16, %v1530_v0  ;;  %v3494_v29 = vcombine.low %v1247_v14, %v1250_v22  ;;  %v1069_v30 = vrot.slane %v1067_v17, 4 }
  0x9e   : > { %v1541_v33 = vsel %vm4538_vm5, %v1536_v21, %v1540_v10  ;;  %v1072_v34 = vrot.slane %v1070_v18, 5  ;;  %v1078_v35 = vrot.slane %v1076_v19, 5  ;;  %v1082_v36 = vrot.slane %v1080_v25, 4  ;;  %v4203_v10 = vld [vmem:[%s4515_s17 + $0x60] sm:$0xff]   ;;  %v3543_v18 = vld [vmem:[%s4515_s17 + $0x6c] sm:$0xf] }
  0x9f   : > { %2689 = vmatmul.mubr.bf16.gmra.mrb[52].mxu0 %v3453_v27  ;;  %v3551_v38 = vcombine.low %v1531_v28, %v1541_v33  ;;  %v1086_v39 = vshll.u32 %v3444_v24, 16  ;;  %v1543_v40 = vshrl.u32 %v3540_v26, 16  ;;  %v1546_v41 = vshll.u32 %v3540_v26, 16  ;;  %v3544_v19 = vld [vmem:[%s4515_s17 + $0x70] sm:$0xf] }
  0xa0   : > { %2696 = vmatprep.mubr.bf16.mxu0 %v3494_v29  ;;  %v1073_v42 = vor.u32 %v1072_v34, %v1069_v30  ;;  %v1083_v43 = vor.u32 %v1082_v36, %v1078_v35  ;;  %v1552_v44 = vshll.u32 %v3541_v31, 16  ;;  %v1556_v45 = vshrl.u32 %v3541_v31, 16  ;;  %v3545_v25 = vld [vmem:[%s4515_s17 + $0x74] sm:$0x1]  ;;  %v3554_v26 = vld [vmem:[%s4515_s17 + $0x18] sm:$0xe] }
  0xa1   : > { %2785 = vmatprep.mubr.bf16.mxu1 %v3551_v38  ;;  %v1088_v49 = vrot.slane %v1086_v39, 5  ;;  %v1545_v50 = vrot.slane %v1543_v40, 4  ;;  %v1548_v52 = vrot.slane %v1546_v41, 5  ;;  %v1562_v53 = vshll.u32 %v3542_v32, 16  ;;  %v3555_v31 = vld [vmem:[%s4515_s17 + $0x1c] sm:$0xf] }
  0xa2   : > { %2786 = vmatmul.mubr.bf16.gmra.mrb[52].mxu1 %v4201_v23  ;;  %v1074_v56 = vrot.slane %v1073_v42, 4  ;;  %v1084_v57 = vrot.slane %v1083_v43, 4  ;;  %v1554_v58 = vrot.slane %v1552_v44, 5  ;;  %v1558_v59 = vrot.slane %v1556_v45, 4  ;;  %v3557_v40 = vld [vmem:[%s4515_s17 + $0x24] sm:$0xe] }
  0xa3   : > { %v1549_v60 = vor.u32 %v1548_v52, %v1545_v50  ;;  %v1564_v61 = vrot.slane %v1562_v53, 5  ;;  %v3487_v62 = vrot.slane %v3477_v37, 9  ;;  %v1253_v63 = vrot.slane %v3478_v47, 5  ;;  %v3558_v45 = vld [vmem:[%s4515_s17 + $0x28] sm:$0xf] }
  0xa4   : > { %v1079_v0 = vsel %vm4538_vm5, %v1074_v56, %v1078_v35  ;;  %v1089_v1 = vsel %vm4538_vm5, %v1084_v57, %v1088_v49  ;;  %v1559_v2 = vor.u32 %v1558_v59, %v1554_v58  ;;  %v1256_v3 = vrot.slane %v3479_v48, 5  ;;  %v3556_v35 = vld [vmem:[%s4515_s17 + $0x20] sm:$0x1]  ;;  %v3559_v52 = vld [vmem:[%s4515_s17 + $0x2c] sm:$0x1] }
  0xa5   : > { %v3454_v5 = vcombine.low %v1079_v0, %v1089_v1  ;;  %v1550_v6 = vrot.slane %v1549_v60, 4  ;;  %v1254_v7 = vsel %vm4529_vm4, %v3487_v62, %v1253_v63  ;;  %v1255_v8 = vrot.slane %v1253_v63, 4  ;;  %v3560_v57 = vld [vmem:[%s4515_s17 + $0x30] sm:$0xe] }
  0xa6   : > { %v1560_v9 = vrot.slane %v1559_v2, 4  ;;  %v1091_v11 = vshrl.u32 %v3445_v54, 16  ;;  %v1094_v12 = vshll.u32 %v3445_v54, 16  ;;  %v1100_v13 = vshll.u32 %v3446_v55, 16 }
  0xa7   : > { %2697 = vmatmul.mubr.bf16.gmra.mrb[56].mxu0 %v3454_v5  ;;  %v1555_v14 = vsel %vm4538_vm5, %v1550_v6, %v1554_v58  ;;  %v1257_v15 = vsel %vm4529_vm4, %v1255_v8, %v1256_v3  ;;  %v1104_v16 = vshrl.u32 %v3446_v55, 16  ;;  %v1110_v17 = vshll.u32 %v3447_v4, 16  ;;  %v3561_v58 = vld [vmem:[%s4515_s17 + $0x34] sm:$0xf]  ;;  %v3562_v3 = vld [vmem:[%s4515_s17 + $0x38] sm:$0x1] }
  0xa8   : > { %v1565_v20 = vsel %vm4538_vm5, %v1560_v9, %v1564_v61  ;;  %v3495_v21 = vcombine.low %v1254_v7, %v1257_v15  ;;  %v1093_v22 = vrot.slane %v1091_v11, 4  ;;  %v1096_v24 = vrot.slane %v1094_v12, 5  ;;  %v3564_v8 = vld [vmem:[%s4515_s17 + $0x40] sm:$0xf] }
  0xa9   : > { %v3552_v27 = vcombine.low %v1555_v14, %v1565_v20  ;;  %v1102_v28 = vrot.slane %v1100_v13, 5  ;;  %v1106_v29 = vrot.slane %v1104_v16, 4  ;;  %v1112_v30 = vrot.slane %v1110_v17, 5  ;;  %v3563_v13 = vld [vmem:[%s4515_s17 + $0x3c] sm:$0xe] }
  0xaa   : > { %2704 = vmatprep.mubr.bf16.mxu0 %v3495_v21  ;;  %v1097_v32 = vor.u32 %v1096_v24, %v1093_v22  ;;  %v1567_v33 = vshrl.u32 %v3543_v18, 16  ;;  %v1570_v23 = vshll.u32 %v3543_v18, 16  ;;  %v1576_v34 = vshll.u32 %v3544_v19, 16  ;;  %v3565_v14 = vld [vmem:[%s4515_s17 + $0x44] sm:$0x1] }
  0xab   : > { %2793 = vmatprep.mubr.bf16.mxu1 %v3552_v27  ;;  %v1107_v36 = vor.u32 %v1106_v29, %v1102_v28  ;;  %v1580_v37 = vshrl.u32 %v3544_v19, 16  ;;  %v1586_v38 = vshll.u32 %v3545_v25, 16  ;;  %v3578_v39 = vrot.slane %v3554_v26, 9  ;;  %v3566_v19 = vld [vmem:[%s4515_s17 + $0x48] sm:$0xe] }
  0xac   : > { %2794 = vmatmul.mubr.bf16.gmra.mrb[56].mxu1 %v4203_v10  ;;  %v1098_v41 = vrot.slane %v1097_v32, 4  ;;  %v1569_v42 = vrot.slane %v1567_v33, 4  ;;  %v1572_v43 = vrot.slane %v1570_v23, 5  ;;  %v1578_v44 = vrot.slane %v1576_v34, 5  ;;  %v4205_v10 = vld [vmem:[%s4515_s17 + $0x6c] sm:$0xff]  }
  0xad   : > { %v1108_v47 = vrot.slane %v1107_v36, 4  ;;  %v1582_v48 = vrot.slane %v1580_v37, 4  ;;  %v1588_v49 = vrot.slane %v1586_v38, 5  ;;  %v1680_v50 = vrot.slane %v3555_v31, 5  ;;  %v3567_v20 = vld [vmem:[%s4515_s17 + $0x4c] sm:$0xf] }
  0xae   : > { %v1103_v53 = vsel %vm4538_vm5, %v1098_v41, %v1102_v28  ;;  %v1573_v54 = vor.u32 %v1572_v43, %v1569_v42  ;;  %v1683_v55 = vrot.slane %v3556_v35, 5  ;;  %v3579_v56 = vrot.slane %v3557_v40, 9  ;;  %v3568_v26 = vld [vmem:[%s4515_s17 + $0x50] sm:$0x1]  ;;  %v3573_v36 = vld [vmem:[%s4515_s17 + $0x64] sm:$0xf] }
  0xaf   : > { %v1113_v59 = vsel %vm4538_vm5, %v1108_v47, %v1112_v30  ;;  %v1583_v60 = vor.u32 %v1582_v48, %v1578_v44  ;;  %v1681_v61 = vsel %vm4529_vm4, %v3578_v39, %v1680_v50  ;;  %v1682_v62 = vrot.slane %v1680_v50, 4  ;;  %v3570_v30 = vld [vmem:[%s4515_s17 + $0x58] sm:$0xf]  ;;  %v3569_v37 = vld [vmem:[%s4515_s17 + $0x54] sm:$0xe] }
  0xb0   : > { %v3455_v63 = vcombine.low %v1103_v53, %v1113_v59  ;;  %v1574_v0 = vrot.slane %v1573_v54, 4  ;;  %v1687_v1 = vrot.slane %v3558_v45, 5  ;;  %v1690_v2 = vrot.slane %v3559_v52, 5  ;;  %v3571_v38 = vld [vmem:[%s4515_s17 + $0x5c] sm:$0x1] }
  0xb1   : > { %v1584_v4 = vrot.slane %v1583_v60, 4  ;;  %v1684_v5 = vsel %vm4529_vm4, %v1682_v62, %v1683_v55  ;;  %v3580_v6 = vrot.slane %v3560_v57, 9  ;;  %v1694_v7 = vrot.slane %v3561_v58, 5  ;;  %v3572_v45 = vld [vmem:[%s4515_s17 + $0x60] sm:$0xe] }
  0xb2   : > { %2705 = vmatmul.mubr.bf16.gmra.mrb[60].mxu0 %v3455_v63  ;;  %v1579_v9 = vsel %vm4538_vm5, %v1574_v0, %v1578_v44  ;;  %v3586_v11 = vcombine.low %v1681_v61, %v1684_v5  ;;  %v1689_v12 = vrot.slane %v1687_v1, 4  ;;  %v1688_v16 = vsel %vm4529_vm4, %v3579_v56, %v1687_v1  ;;  %v3574_v47 = vld [vmem:[%s4515_s17 + $0x68] sm:$0x1]  ;;  %v3576_v57 = vld [vmem:[%s4515_s17 + $0x70] sm:$0xf] }
  0xb3   : > { %v1589_v15 = vsel %vm4538_vm5, %v1584_v4, %v1588_v49  ;;  %v1696_v17 = vrot.slane %v1694_v7, 4  ;;  %v1697_v18 = vrot.slane %v3562_v3, 5  ;;  %v1695_v24 = vsel %vm4529_vm4, %v3580_v6, %v1694_v7  ;;  %v3575_v63 = vld [vmem:[%s4515_s17 + $0x6c] sm:$0xe]  ;;  %v3577_v0 = vld [vmem:[%s4515_s17 + $0x74] sm:$0x1] }
  0xb4   : > { %v3553_v21 = vcombine.low %v1579_v9, %v1589_v15  ;;  %3988 = vmatprep.mubr.bf16.mxu0 %v3586_v11  ;;  %v1691_v22 = vsel %vm4529_vm4, %v1689_v12, %v1690_v2  ;;  %v1701_v25 = vrot.slane %v3564_v8, 5  ;;  %v3581_v28 = vrot.slane %v3563_v13, 9  ;;  %v4206_v9 = vld [vmem:[%s5273_s4] sm:$0xff]   ;;  %v4208_v11 = vld [vmem:[%s5273_s4 + $0x10] sm:$0xff]   ;;  %s3680_s17 = sshll.u32 %s3206_s19, 7 }
  0xb5   : > { %v1698_v51 = vsel %vm4529_vm4, %v1696_v17, %v1697_v18  ;;  %v3587_v27 = vcombine.low %v1688_v16, %v1691_v22  ;;  %v1708_v29 = vrot.slane %v3567_v20, 5  ;;  %v1704_v33 = vrot.slane %v3565_v14, 5  ;;  %4004 = vmatprep.subr.bf16.mxu1 %v4206_v9  ;;  %s5208_s18 = scalar_lea.hbm %s5275_s6, %s3680_s17 }
  0xb6   : > { %2801 = vmatprep.mubr.bf16.mxu1 %v3553_v21  ;;  %v3588_v31 = vcombine.low %v1695_v24, %v1698_v51  ;;  %v1703_v32 = vrot.slane %v1701_v25, 4  ;;  %v3582_v23 = vrot.slane %v3566_v19, 9  ;;  %v1711_v35 = vrot.slane %v3568_v26, 5  ;;  %4005 = vmatpush3.bf16.msra.mxu1 %v4206_v9  ;;  %v4209_v51 = vld [vmem:[%s5273_s4 + $0x18] sm:$0xff]  }
  0xb7   : > { %2802 = vmatmul.mubr.bf16.gmra.mrb[60].mxu1 %v4205_v10  ;;  %v1710_v34 = vrot.slane %v1708_v29, 4  ;;  %v1702_v39 = vsel %vm4529_vm4, %v3581_v28, %v1701_v25  ;;  %v1715_v41 = vrot.slane %v3570_v30, 5  ;;  %v1722_v44 = vrot.slane %v3573_v36, 5  ;;  %v4207_v10 = vld [vmem:[%s5273_s4 + $0x8] sm:$0xff]  }
  0xb8   : > { %v1705_v40 = vsel %vm4529_vm4, %v1703_v32, %v1704_v33  ;;  %v1709_v42 = vsel %vm4529_vm4, %v3582_v23, %v1708_v29  ;;  %v3583_v50 = vrot.slane %v3569_v37, 9  ;;  %v1718_v53 = vrot.slane %v3571_v38, 5  ;;  %4006 = vmatprep.subr.bf16.mxu1 %v4207_v10 }
  0xb9   : > { %v1712_v43 = vsel %vm4529_vm4, %v1710_v34, %v1711_v35  ;;  %v3589_v48 = vcombine.low %v1702_v39, %v1705_v40  ;;  %v1717_v52 = vrot.slane %v1715_v41, 4  ;;  %v3584_v54 = vrot.slane %v3572_v45, 9  ;;  %v4210_v39 = vld [vmem:[%s5273_s4 + $0x20] sm:$0xff]  }
  0xba   : > { %3989 = vmatmul.mubr.bf16.vlgmr.msra.gmra.mrb[64].mxu0 %v3587_v27  ;;  %v3590_v49 = vcombine.low %v1709_v42, %v1712_v43  ;;  %v1724_v55 = vrot.slane %v1722_v44, 4  ;;  %v1725_v56 = vrot.slane %v3574_v47, 5  ;;  %v1716_v58 = vsel %vm4529_vm4, %v3583_v50, %v1715_v41  ;;  %4007 = vmatpush3.bf16.msra.mxu1 %v4207_v10 }
  0xbb   : > { %3992 = vmatprep.mubr.bf16.mxu0 %v3588_v31  ;;  %v1719_v59 = vsel %vm4529_vm4, %v1717_v52, %v1718_v53  ;;  %v1729_v60 = vrot.slane %v3576_v57, 5  ;;  %v1723_v61 = vsel %vm4529_vm4, %v3584_v54, %v1722_v44  ;;  %v3585_v3 = vrot.slane %v3575_v63, 9  ;;  %4008 = vmatprep.subr.bf16.mxu1 %v4208_v11 }
  0xbc   : > { %v1726_v62 = vsel %vm4529_vm4, %v1724_v55, %v1725_v56  ;;  %v3591_v1 = vcombine.low %v1716_v58, %v1719_v59  ;;  %v1732_v5 = vrot.slane %v3577_v0, 5 }
  0xbd   : > { %v3592_v2 = vcombine.low %v1723_v61, %v1726_v62  ;;  %v1731_v4 = vrot.slane %v1729_v60, 4  ;;  %v1730_v6 = vsel %vm4529_vm4, %v3585_v3, %v1729_v60  ;;  %v4211_v62 = vld [vmem:[%s5273_s4 + $0x28] sm:$0xff]  }
  0xbe   : > { %4009 = vmatpush3.bf16.msra.mxu1 %v4208_v11 }
  0xbf   : > { %v1733_v7 = vsel %vm4529_vm4, %v1731_v4, %v1732_v5  ;;  %4010 = vmatprep.subr.bf16.mxu1 %v4209_v51 }
  0xc0   : > { %v3593_v8 = vcombine.low %v1730_v6, %v1733_v7 }
  0xc2   : > { %3993 = vmatmul.mubr.bf16.gmra.mrb[68].mxu0 %v3589_v48  ;;  %4011 = vmatpush3.bf16.msra.mxu1 %v4209_v51 }
  0xc3   : > { %3996 = vmatprep.mubr.bf16.mxu0 %v3590_v49  ;;  %4012 = vmatprep.subr.bf16.mxu1 %v4210_v39 }
  0xc6   : > { %4013 = vmatpush3.bf16.msra.mxu1 %v4210_v39 }
  0xc7   : > { %4014 = vmatprep.subr.bf16.mxu1 %v4211_v62 }
  0xca   : > { %3997 = vmatmul.mubr.bf16.gmra.mrb[72].mxu0 %v3591_v1  ;;  %4015 = vmatpush3.bf16.msra.mxu1 %v4211_v62 }
  0xcb   : > { %4000 = vmatprep.mubr.bf16.mxu0 %v3592_v2 }
  0xd2   : > { %4001 = vmatmul.mubr.bf16.gmra.mrb[76].mxu0 %v3593_v8 }
 0x107   : > { %v3700_v12 = vpop.f32.mrb[0].mxu0 }
 0x108   : > { %v3764_v46 = vpop.f32.mrb[0].mxu1  ;;  %v3701_v14 = vpop.f32.mrb[1].mxu0 }
 0x109   : > { %v3765_v13 = vpop.f32.mrb[1].mxu1  ;;  %v3702_v17 = vadd.f32 %v3701_v14, %v3700_v12  ;;  %v3703_v18 = vpop.f32.mrb[2].mxu0 }
 0x10a   : > { %v3766_v15 = vadd.f32 %v3765_v13, %v3764_v46  ;;  %v3767_v16 = vpop.f32.mrb[2].mxu1  ;;  %v3704_v20 = vpop.f32.mrb[3].mxu0 }
 0x10b   : > { %v3768_v19 = vpop.f32.mrb[3].mxu1  ;;  %v3705_v24 = vadd.f32 %v3704_v20, %v3703_v18  ;;  %v4212_v20 = vld [vmem:[%s5273_s4 + $0x30] sm:$0xff]  }
 0x10c   : > { %v3769_v21 = vadd.f32 %v3768_v19, %v3767_v16  ;;  %v5028_v22 = vadd.f32 %v3766_v15, %v3702_v17  ;;  %4016 = vmatprep.subr.bf16.mxu1 %v4212_v20 }
 0x10d   : > { %4017 = vmatpush3.bf16.msra.mxu1 %v4212_v20 }
 0x10e   : > { %v5030_v25 = vadd.f32 %v3769_v21, %v3705_v24 }
 0x10f   : > { %v3706_v27 = vpop.f32.mrb[4].mxu0 }
 0x110   : > { %v3770_v26 = vpop.f32.mrb[4].mxu1  ;;  %v3707_v29 = vpop.f32.mrb[5].mxu0 }
 0x111   : > { %v3771_v28 = vpop.f32.mrb[5].mxu1  ;;  %v3708_v32 = vadd.f32 %v3707_v29, %v3706_v27  ;;  %v3709_v33 = vpop.f32.mrb[6].mxu0 }
 0x112   : > { %v3772_v30 = vadd.f32 %v3771_v28, %v3770_v26  ;;  %v3773_v31 = vpop.f32.mrb[6].mxu1  ;;  %v3710_v34 = vpop.f32.mrb[7].mxu0 }
 0x113   : > { %v3774_v23 = vpop.f32.mrb[7].mxu1  ;;  %v3711_v37 = vadd.f32 %v3710_v34, %v3709_v33 }
 0x114   : > { %v3775_v35 = vadd.f32 %v3774_v23, %v3773_v31  ;;  %v5035_v36 = vadd.f32 %v3772_v30, %v3708_v32  ;;  %v4213_v32 = vld [vmem:[%s5273_s4 + $0x38] sm:$0xff]  }
 0x115   : > { %4018 = vmatprep.subr.bf16.mxu1 %v4213_v32 }
 0x116   : > { %v5037_v38 = vadd.f32 %v3775_v35, %v3711_v37  ;;  %4019 = vmatpush3.bf16.msra.mxu1 %v4213_v32 }
 0x117   : > { %v3712_v41 = vpop.f32.mrb[8].mxu0 }
 0x118   : > { %v3776_v40 = vpop.f32.mrb[8].mxu1  ;;  %v3713_v43 = vpop.f32.mrb[9].mxu0 }
 0x119   : > { %v3777_v42 = vpop.f32.mrb[9].mxu1  ;;  %v3714_v47 = vadd.f32 %v3713_v43, %v3712_v41  ;;  %v3715_v48 = vpop.f32.mrb[10].mxu0 }
 0x11a   : > { %v3778_v44 = vadd.f32 %v3777_v42, %v3776_v40  ;;  %v3779_v45 = vpop.f32.mrb[10].mxu1  ;;  %v3716_v50 = vpop.f32.mrb[11].mxu0 }
 0x11b   : > { %v3780_v49 = vpop.f32.mrb[11].mxu1  ;;  %v3717_v54 = vadd.f32 %v3716_v50, %v3715_v48 }
 0x11c   : > { %v3781_v52 = vadd.f32 %v3780_v49, %v3779_v45  ;;  %v5042_v53 = vadd.f32 %v3778_v44, %v3714_v47 }
 0x11e   : > { %v5044_v55 = vadd.f32 %v3781_v52, %v3717_v54 }
 0x11f   : > { %v3718_v57 = vpop.f32.mrb[12].mxu0 }
 0x120   : > { %v3782_v56 = vpop.f32.mrb[12].mxu1  ;;  %v3719_v59 = vpop.f32.mrb[13].mxu0 }
 0x121   : > { %v3783_v58 = vpop.f32.mrb[13].mxu1  ;;  %v3720_v63 = vadd.f32 %v3719_v59, %v3718_v57  ;;  %v3721_v0 = vpop.f32.mrb[14].mxu0 }
 0x122   : > { %v3784_v60 = vadd.f32 %v3783_v58, %v3782_v56  ;;  %v3785_v61 = vpop.f32.mrb[14].mxu1  ;;  %v3722_v2 = vpop.f32.mrb[15].mxu0 }
 0x123   : > { %v3786_v1 = vpop.f32.mrb[15].mxu1  ;;  %v3723_v5 = vadd.f32 %v3722_v2, %v3721_v0 }
 0x124   : > { %v3787_v3 = vadd.f32 %v3786_v1, %v3785_v61  ;;  %v5049_v4 = vadd.f32 %v3784_v60, %v3720_v63 }
 0x126   : > { %v5051_v6 = vadd.f32 %v3787_v3, %v3723_v5 }
 0x127   : > { %v3724_v8 = vpop.f32.mrb[16].mxu0 }
 0x128   : > { %v3788_v7 = vpop.f32.mrb[16].mxu1  ;;  %v3725_v10 = vpop.f32.mrb[17].mxu0 }
 0x129   : > { %v3789_v9 = vpop.f32.mrb[17].mxu1  ;;  %v3726_v12 = vadd.f32 %v3725_v10, %v3724_v8  ;;  %v3727_v13 = vpop.f32.mrb[18].mxu0 }
 0x12a   : > { %v3790_v11 = vadd.f32 %v3789_v9, %v3788_v7  ;;  %v3791_v46 = vpop.f32.mrb[18].mxu1  ;;  %v3728_v15 = vpop.f32.mrb[19].mxu0 }
 0x12b   : > { %v3792_v14 = vpop.f32.mrb[19].mxu1  ;;  %v3729_v18 = vadd.f32 %v3728_v15, %v3727_v13 }
 0x12c   : > { %v3793_v16 = vadd.f32 %v3792_v14, %v3791_v46  ;;  %v5053_v17 = vadd.f32 %v3790_v11, %v3726_v12 }
 0x12e   : > { %v5055_v19 = vadd.f32 %v3793_v16, %v3729_v18 }
 0x12f   : > { %v3730_v24 = vpop.f32.mrb[20].mxu0 }
 0x130   : > { %v3794_v21 = vpop.f32.mrb[20].mxu1  ;;  %v3731_v26 = vpop.f32.mrb[21].mxu0 }
 0x131   : > { %v3795_v51 = vpop.f32.mrb[21].mxu1  ;;  %v3732_v29 = vadd.f32 %v3731_v26, %v3730_v24  ;;  %v3733_v30 = vpop.f32.mrb[22].mxu0 }
 0x132   : > { %v3796_v27 = vadd.f32 %v3795_v51, %v3794_v21  ;;  %v3797_v28 = vpop.f32.mrb[22].mxu1  ;;  %v3734_v33 = vpop.f32.mrb[23].mxu0 }
 0x133   : > { %v3798_v31 = vpop.f32.mrb[23].mxu1  ;;  %v3735_v35 = vadd.f32 %v3734_v33, %v3733_v30 }
 0x134   : > { %v3799_v23 = vadd.f32 %v3798_v31, %v3797_v28  ;;  %v5063_v34 = vadd.f32 %v3796_v27, %v3732_v29 }
 0x136   : > { %v5065_v37 = vadd.f32 %v3799_v23, %v3735_v35 }
 0x137   : > { %v3736_v39 = vpop.f32.mrb[24].mxu0 }
 0x138   : > { %v3800_v40 = vpop.f32.mrb[24].mxu1  ;;  %v3737_v41 = vpop.f32.mrb[25].mxu0 }
 0x139   : > { %v3801_v42 = vpop.f32.mrb[25].mxu1  ;;  %v3738_v43 = vadd.f32 %v3737_v41, %v3736_v39  ;;  %v3739_v45 = vpop.f32.mrb[26].mxu0 }
 0x13a   : > { %v3802_v44 = vadd.f32 %v3801_v42, %v3800_v40  ;;  %v3803_v47 = vpop.f32.mrb[26].mxu1  ;;  %v3740_v48 = vpop.f32.mrb[27].mxu0 }
 0x13b   : > { %v3804_v49 = vpop.f32.mrb[27].mxu1  ;;  %v3741_v52 = vadd.f32 %v3740_v48, %v3739_v45 }
 0x13c   : > { %v5067_v50 = vadd.f32 %v3802_v44, %v3738_v43  ;;  %v3805_v54 = vadd.f32 %v3804_v49, %v3803_v47 }
 0x13e   : > { %v5069_v56 = vadd.f32 %v3805_v54, %v3741_v52 }
 0x13f   : > { %v3742_v57 = vpop.f32.mrb[28].mxu0 }
 0x140   : > { %v3806_v58 = vpop.f32.mrb[28].mxu1  ;;  %v3743_v59 = vpop.f32.mrb[29].mxu0 }
 0x141   : > { %v3807_v60 = vpop.f32.mrb[29].mxu1  ;;  %v3744_v61 = vadd.f32 %v3743_v59, %v3742_v57  ;;  %v3745_v63 = vpop.f32.mrb[30].mxu0 }
 0x142   : > { %v3808_v62 = vadd.f32 %v3807_v60, %v3806_v58  ;;  %v3809_v0 = vpop.f32.mrb[30].mxu1  ;;  %v3746_v1 = vpop.f32.mrb[31].mxu0 }
 0x143   : > { %v3810_v2 = vpop.f32.mrb[31].mxu1  ;;  %v3747_v5 = vadd.f32 %v3746_v1, %v3745_v63 }
 0x144   : > { %v5071_v3 = vadd.f32 %v3808_v62, %v3744_v61  ;;  %v3811_v7 = vadd.f32 %v3810_v2, %v3809_v0 }
 0x146   : > { %v5073_v8 = vadd.f32 %v3811_v7, %v3747_v5 }
 0x147   : > { %v3828_v9 = vpop.f32.mrb[32].mxu0 }
 0x148   : > { %v3829_v10 = vpop.f32.mrb[33].mxu0 }
 0x149   : > { %v3830_v11 = vadd.f32 %v3829_v10, %v3828_v9  ;;  %v3831_v46 = vpop.f32.mrb[34].mxu0  ;;  %v3892_v15 = vpop.f32.mrb[32].mxu1 }
 0x14a   : > { %v3832_v12 = vpop.f32.mrb[35].mxu0  ;;  %v3893_v18 = vpop.f32.mrb[33].mxu1 }
 0x14b   : > { %v2651_v13 = vadd.f32 %v3830_v11, %v5028_v22  ;;  %v3833_v14 = vadd.f32 %v3832_v12, %v3831_v46  ;;  %v3894_v20 = vadd.f32 %v3893_v18, %v3892_v15  ;;  %v3895_v21 = vpop.f32.mrb[34].mxu1 }
 0x14c   : > { %v3896_v24 = vpop.f32.mrb[35].mxu1 }
 0x14d   : > { %v2654_v16 = vadd.f32 %v3833_v14, %v5030_v25  ;;  %v3897_v51 = vadd.f32 %v3896_v24, %v3895_v21  ;;  %v5077_v26 = vadd.f32 %v3894_v20, %v2651_v13 }
 0x14f   : > { %v3834_v27 = vpop.f32.mrb[36].mxu0  ;;  %v5079_v28 = vadd.f32 %v3897_v51, %v2654_v16 }
 0x150   : > { %v3835_v29 = vpop.f32.mrb[37].mxu0 }
 0x151   : > { %v3836_v30 = vadd.f32 %v3835_v29, %v3834_v27  ;;  %v3837_v31 = vpop.f32.mrb[38].mxu0 }
 0x152   : > { %v3838_v32 = vpop.f32.mrb[39].mxu0 }
 0x153   : > { %v2659_v22 = vadd.f32 %v3836_v30, %v5035_v36  ;;  %v3839_v23 = vadd.f32 %v3838_v32, %v3837_v31 }
 0x154   : > { %v3898_v33 = vpop.f32.mrb[36].mxu1 }
 0x155   : > { %v3899_v35 = vpop.f32.mrb[37].mxu1  ;;  %v2662_v25 = vadd.f32 %v3839_v23, %v5037_v38 }
 0x156   : > { %v3900_v39 = vadd.f32 %v3899_v35, %v3898_v33  ;;  %v3901_v40 = vpop.f32.mrb[38].mxu1 }
 0x157   : > { %v3902_v41 = vpop.f32.mrb[39].mxu1  ;;  %v3840_v44 = vpop.f32.mrb[40].mxu0 }
 0x158   : > { %v3903_v42 = vadd.f32 %v3902_v41, %v3901_v40  ;;  %v5083_v43 = vadd.f32 %v3900_v39, %v2659_v22  ;;  %v3841_v47 = vpop.f32.mrb[41].mxu0 }
 0x159   : > { %v3842_v48 = vadd.f32 %v3841_v47, %v3840_v44  ;;  %v3843_v49 = vpop.f32.mrb[42].mxu0 }
 0x15a   : > { %v5085_v45 = vadd.f32 %v3903_v42, %v2662_v25  ;;  %v3844_v52 = vpop.f32.mrb[43].mxu0 }
 0x15b   : > { %v2667_v36 = vadd.f32 %v3842_v48, %v5042_v53  ;;  %v3845_v57 = vadd.f32 %v3844_v52, %v3843_v49 }
 0x15c   : > { %v3904_v54 = vpop.f32.mrb[40].mxu1 }
 0x15d   : > { %v3905_v58 = vpop.f32.mrb[41].mxu1  ;;  %v2670_v38 = vadd.f32 %v3845_v57, %v5044_v55 }
 0x15e   : > { %v3906_v59 = vadd.f32 %v3905_v58, %v3904_v54  ;;  %v3907_v60 = vpop.f32.mrb[42].mxu1 }
 0x15f   : > { %v3908_v61 = vpop.f32.mrb[43].mxu1  ;;  %v3846_v0 = vpop.f32.mrb[44].mxu0 }
 0x160   : > { %v3909_v62 = vadd.f32 %v3908_v61, %v3907_v60  ;;  %v5089_v63 = vadd.f32 %v3906_v59, %v2667_v36  ;;  %v3847_v2 = vpop.f32.mrb[45].mxu0 }
 0x161   : > { %v3848_v5 = vadd.f32 %v3847_v2, %v3846_v0  ;;  %v3849_v7 = vpop.f32.mrb[46].mxu0 }
 0x162   : > { %v5091_v1 = vadd.f32 %v3909_v62, %v2670_v38  ;;  %v3850_v9 = vpop.f32.mrb[47].mxu0 }
 0x163   : > { %v2675_v53 = vadd.f32 %v3848_v5, %v5049_v4  ;;  %v3851_v10 = vadd.f32 %v3850_v9, %v3849_v7 }
 0x164   : > { %v3910_v11 = vpop.f32.mrb[44].mxu1 }
 0x165   : > { %v2678_v46 = vadd.f32 %v3851_v10, %v5051_v6  ;;  %v3911_v55 = vpop.f32.mrb[45].mxu1 }
 0x166   : > { %v3912_v12 = vadd.f32 %v3911_v55, %v3910_v11  ;;  %v3913_v13 = vpop.f32.mrb[46].mxu1 }
 0x167   : > { %v3914_v14 = vpop.f32.mrb[47].mxu1 }
 0x168   : > { %v3915_v15 = vadd.f32 %v3914_v14, %v3913_v13  ;;  %v5095_v16 = vadd.f32 %v3912_v12, %v2675_v53 }
 0x169   : > { %v3852_v18 = vpop.f32.mrb[48].mxu0 }
 0x16a   : > { %v5097_v20 = vadd.f32 %v3915_v15, %v2678_v46  ;;  %v3853_v21 = vpop.f32.mrb[49].mxu0 }
 0x16b   : > { %v3854_v24 = vadd.f32 %v3853_v21, %v3852_v18  ;;  %v3855_v51 = vpop.f32.mrb[50].mxu0 }
 0x16c   : > { %v3856_v27 = vpop.f32.mrb[51].mxu0  ;;  %v3916_v29 = vpop.f32.mrb[48].mxu1 }
 0x16d   : > { %v2683_v4 = vadd.f32 %v3854_v24, %v5053_v17  ;;  %v3857_v30 = vadd.f32 %v3856_v27, %v3855_v51  ;;  %v3917_v31 = vpop.f32.mrb[49].mxu1 }
 0x16e   : > { %v3918_v32 = vadd.f32 %v3917_v31, %v3916_v29  ;;  %v3919_v22 = vpop.f32.mrb[50].mxu1  ;;  %v5122_v31 = vld [vmem:[%s5271_s2] ss:$0 sm:$0xff] }
 0x16f   : > { %v2686_v6 = vadd.f32 %v3857_v30, %v5055_v19  ;;  %v3920_v33 = vpop.f32.mrb[51].mxu1 }
 0x170   : > { %v3921_v23 = vadd.f32 %v3920_v33, %v3919_v22  ;;  %v5101_v35 = vadd.f32 %v3918_v32, %v2683_v4 }
 0x172   : > { %v5103_v25 = vadd.f32 %v3921_v23, %v2686_v6  ;;  %v3858_v39 = vpop.f32.mrb[52].mxu0 }
 0x173   : > { %v3859_v40 = vpop.f32.mrb[53].mxu0 }
 0x174   : > { %v3860_v41 = vadd.f32 %v3859_v40, %v3858_v39  ;;  %v3861_v42 = vpop.f32.mrb[54].mxu0 }
 0x175   : > { %v3922_v44 = vpop.f32.mrb[52].mxu1  ;;  %v3862_v47 = vpop.f32.mrb[55].mxu0 }
 0x176   : > { %v2691_v17 = vadd.f32 %v3860_v41, %v5063_v34  ;;  %v3863_v48 = vadd.f32 %v3862_v47, %v3861_v42  ;;  %v3923_v49 = vpop.f32.mrb[53].mxu1 }
 0x177   : > { %v3924_v52 = vadd.f32 %v3923_v49, %v3922_v44  ;;  %v3925_v19 = vpop.f32.mrb[54].mxu1 }
 0x178   : > { %v2694_v36 = vadd.f32 %v3863_v48, %v5065_v37  ;;  %v3926_v54 = vpop.f32.mrb[55].mxu1 }
 0x179   : > { %v3927_v57 = vadd.f32 %v3926_v54, %v3925_v19  ;;  %v5107_v58 = vadd.f32 %v3924_v52, %v2691_v17 }
 0x17a   : > { %v3864_v38 = vpop.f32.mrb[56].mxu0 }
 0x17b   : > { %v3865_v59 = vpop.f32.mrb[57].mxu0  ;;  %v5109_v60 = vadd.f32 %v3927_v57, %v2694_v36 }
 0x17c   : > { %v3866_v61 = vadd.f32 %v3865_v59, %v3864_v38  ;;  %v3867_v62 = vpop.f32.mrb[58].mxu0 }
 0x17d   : > { %v3868_v0 = vpop.f32.mrb[59].mxu0 }
 0x17e   : > { %v2699_v2 = vadd.f32 %v3866_v61, %v5067_v50  ;;  %v3869_v34 = vadd.f32 %v3868_v0, %v3867_v62 }
 0x17f   : > { %v3928_v5 = vpop.f32.mrb[56].mxu1 }
 0x180   : > { %v2702_v7 = vadd.f32 %v3869_v34, %v5069_v56  ;;  %v3929_v9 = vpop.f32.mrb[57].mxu1 }
 0x181   : > { %v3930_v53 = vadd.f32 %v3929_v9, %v3928_v5  ;;  %v3931_v37 = vpop.f32.mrb[58].mxu1 }
 0x182   : > { %v3932_v10 = vpop.f32.mrb[59].mxu1 }
 0x183   : > { %v3933_v11 = vadd.f32 %v3932_v10, %v3931_v37  ;;  %v5113_v46 = vadd.f32 %v3930_v53, %v2699_v2 }
 0x185   : > { %v3870_v55 = vpop.f32.mrb[60].mxu0  ;;  %v5115_v12 = vadd.f32 %v3933_v11, %v2702_v7 }
 0x186   : > { %v3871_v13 = vpop.f32.mrb[61].mxu0 }
 0x187   : > { %v3872_v14 = vadd.f32 %v3871_v13, %v3870_v55  ;;  %v3873_v15 = vpop.f32.mrb[62].mxu0 }
 0x188   : > { %v3874_v18 = vpop.f32.mrb[63].mxu0 }
 0x189   : > { %v2707_v50 = vadd.f32 %v3872_v14, %v5071_v3  ;;  %v3875_v21 = vadd.f32 %v3874_v18, %v3873_v15  ;;  %v5130_v3 = vld [vmem:[%s5272_s3] ss:$0 sm:$0xff] }
 0x18a   : > { %v3934_v24 = vpop.f32.mrb[60].mxu1 }
 0x18b   : > { %v2710_v56 = vadd.f32 %v3875_v21, %v5073_v8  ;;  %v3935_v51 = vpop.f32.mrb[61].mxu1 }
 0x18c   : > { %v3936_v27 = vadd.f32 %v3935_v51, %v3934_v24  ;;  %v3937_v4 = vpop.f32.mrb[62].mxu1 }
 0x18d   : > { %v3938_v29 = vpop.f32.mrb[63].mxu1  ;;  %v3990_v30 = vpop.f32.mrb[64].mxu0 }
 0x18e   : > { %v3939_v6 = vadd.f32 %v3938_v29, %v3937_v4  ;;  %v2853_v32 = vadd.f32 %v3990_v30, %v5083_v43  ;;  %v2844_v22 = vpop.f32.mrb[65].mxu0  ;;  %v5125_v33 = vadd.f32 %v3936_v27, %v2707_v50 }
 0x18f   : > { %v2845_v8 = vadd.f32 %v2844_v22, %v5077_v26  ;;  %v3991_v23 = vpop.f32.mrb[66].mxu0 }
 0x190   : > { %v2916_v39 = vmul.f32 %v5122_v31, %v2853_v32  ;;  %v2856_v40 = vadd.f32 %v3991_v23, %v5085_v45  ;;  %v2847_v41 = vpop.f32.mrb[67].mxu0  ;;  %v5135_v42 = vadd.f32 %v3939_v6, %v2710_v56 }
 0x191   : > { %v2914_v43 = vmul.f32 %v5122_v31, %v2845_v8  ;;  %v2848_v44 = vadd.f32 %v2847_v41, %v5079_v28 }
 0x192   : > { %v2939_v47 = vadd.f32 %v5130_v3, %v2916_v39  ;;  %v2917_v17 = vmul.f32 %v5122_v31, %v2856_v40 }
 0x193   : > { %v2937_v48 = vadd.f32 %v5130_v3, %v2914_v43  ;;  %v2915_v26 = vmul.f32 %v5122_v31, %v2848_v44 }
 0x194   : > { %vm2955_vm6 = vcmp.gt.f32.partialorder %v2939_v47, 0.0  ;;  %v2971_v49 = vmul.f32 0.1, %v2939_v47  ;;  %v2940_v52 = vadd.f32 %v5130_v3, %v2917_v17 }
 0x195   : > { %v2969_v45 = vmul.f32 0.1, %v2937_v48  ;;  %v2938_v19 = vadd.f32 %v5130_v3, %v2915_v26  ;;  %v3994_v36 = vpop.f32.mrb[68].mxu0  ;;  %vm2953_vm7 = vcmp.gt.f32.partialorder %v2937_v48, 0.0 }
 0x196   : > { %vm2956_vm8 = vcmp.gt.f32.partialorder %v2940_v52, 0.0  ;;  %v2972_v54 = vmul.f32 0.1, %v2940_v52  ;;  %v2869_v28 = vadd.f32 %v3994_v36, %v5095_v16  ;;  %v2860_v57 = vpop.f32.mrb[69].mxu0  ;;  %v2987_v38 = vsel %vm2955_vm6, %v2939_v47, %v2971_v49 }
 0x197   : > { %v2970_v59 = vmul.f32 0.1, %v2938_v19  ;;  %v2861_v61 = vadd.f32 %v2860_v57, %v5089_v63  ;;  %v3995_v62 = vpop.f32.mrb[70].mxu0  ;;  %vm2954_vm9 = vcmp.gt.f32.partialorder %v2938_v19, 0.0  ;;  %v2985_v7 = vsel %vm2953_vm7, %v2937_v48, %v2969_v45 }
 0x198   : > { %v2988_v0 = vsel %vm2956_vm8, %v2940_v52, %v2972_v54  ;;  %v2920_v2 = vmul.f32 %v5122_v31, %v2869_v28  ;;  %v2872_v34 = vadd.f32 %v3995_v62, %v5097_v20  ;;  %v2863_v5 = vpop.f32.mrb[71].mxu0 }
 0x199   : > { %v3002_v9 = vpack.c.bf16 %v2988_v0, %v2987_v38  ;;  %v2918_v53 = vmul.f32 %v5122_v31, %v2861_v61  ;;  %v2864_v37 = vadd.f32 %v2863_v5, %v5091_v1  ;;  %v2986_v16 = vsel %vm2954_vm9, %v2938_v19, %v2970_v59 }
 0x19a   : > { %v2943_v10 = vadd.f32 %v5130_v3, %v2920_v2  ;;  %v2921_v11 = vmul.f32 %v5122_v31, %v2872_v34  ;;  %v3001_v63 = vpack.c.bf16 %v2986_v16, %v2985_v7 }
 0x19b   : > { %v2941_v55 = vadd.f32 %v5130_v3, %v2918_v53  ;;  %v2919_v13 = vmul.f32 %v5122_v31, %v2864_v37 }
 0x19c   : > { %v2975_v14 = vmul.f32 0.1, %v2943_v10  ;;  %v2944_v20 = vadd.f32 %v5130_v3, %v2921_v11  ;;  %4020 = vmatprep.mubr.bf16.mxu1 %v3001_v63  ;;  %vm2959_vm10 = vcmp.gt.f32.partialorder %v2943_v10, 0.0 }
 0x19d   : > { %v2973_v15 = vmul.f32 0.1, %v2941_v55  ;;  %v2942_v18 = vadd.f32 %v5130_v3, %v2919_v13  ;;  %v3998_v50 = vpop.f32.mrb[72].mxu0  ;;  %4021 = vmatmul.mubr.bf16.vlgmr.msra.gmra.mrb[64].mxu1 %v3002_v9  ;;  %vm2957_vm11 = vcmp.gt.f32.partialorder %v2941_v55, 0.0 }
 0x19e   : > { %v2976_v1 = vmul.f32 0.1, %v2944_v20  ;;  %v2885_v21 = vadd.f32 %v3998_v50, %v5107_v58  ;;  %v2876_v24 = vpop.f32.mrb[73].mxu0  ;;  %vm2960_vm12 = vcmp.gt.f32.partialorder %v2944_v20, 0.0  ;;  %v2991_v4 = vsel %vm2959_vm10, %v2943_v10, %v2975_v14 }
 0x19f   : > { %v2974_v56 = vmul.f32 0.1, %v2942_v18  ;;  %v2877_v51 = vadd.f32 %v2876_v24, %v5101_v35  ;;  %v3999_v27 = vpop.f32.mrb[74].mxu0  ;;  %vm2958_vm13 = vcmp.gt.f32.partialorder %v2942_v18, 0.0  ;;  %v2989_v32 = vsel %vm2957_vm11, %v2941_v55, %v2973_v15 }
 0x1a0   : > { %v2924_v29 = vmul.f32 %v5122_v31, %v2885_v21  ;;  %v2888_v30 = vadd.f32 %v3999_v27, %v5109_v60  ;;  %v2879_v6 = vpop.f32.mrb[75].mxu0  ;;  %v2992_v22 = vsel %vm2960_vm12, %v2944_v20, %v2976_v1 }
 0x1a1   : > { %v2922_v8 = vmul.f32 %v5122_v31, %v2877_v51  ;;  %v2880_v23 = vadd.f32 %v2879_v6, %v5103_v25  ;;  %v2990_v58 = vsel %vm2958_vm13, %v2942_v18, %v2974_v56  ;;  %v3004_v39 = vpack.c.bf16 %v2992_v22, %v2991_v4 }
 0x1a2   : > { %v2947_v40 = vadd.f32 %v5130_v3, %v2924_v29  ;;  %v2925_v35 = vmul.f32 %v5122_v31, %v2888_v30  ;;  %v3003_v41 = vpack.c.bf16 %v2990_v58, %v2989_v32 }
 0x1a3   : > { %v2945_v43 = vadd.f32 %v5130_v3, %v2922_v8  ;;  %v2923_v44 = vmul.f32 %v5122_v31, %v2880_v23 }
 0x1a4   : > { %v2979_v47 = vmul.f32 0.1, %v2947_v40  ;;  %v2948_v60 = vadd.f32 %v5130_v3, %v2925_v35  ;;  %4024 = vmatprep.mubr.bf16.mxu1 %v3003_v41  ;;  %vm2963_vm14 = vcmp.gt.f32.partialorder %v2947_v40, 0.0 }
 0x1a5   : > { %v2977_v17 = vmul.f32 0.1, %v2945_v43  ;;  %v2946_v48 = vadd.f32 %v5130_v3, %v2923_v44  ;;  %v4002_v25 = vpop.f32.mrb[76].mxu0  ;;  %4025 = vmatmul.mubr.bf16.gmra.mrb[68].mxu1 %v3004_v39  ;;  %vm2961_vm15 = vcmp.gt.f32.partialorder %v2945_v43, 0.0 }
 0x1a6   : > { %v2980_v26 = vmul.f32 0.1, %v2948_v60  ;;  %v2901_v49 = vadd.f32 %v4002_v25, %v5125_v33  ;;  %v2892_v52 = vpop.f32.mrb[77].mxu0  ;;  %vm2964_vm0 = vcmp.gt.f32.partialorder %v2948_v60, 0.0  ;;  %v2995_v54 = vsel %vm2963_vm14, %v2947_v40, %v2979_v47 }
 0x1a7   : > { %v2978_v45 = vmul.f32 0.1, %v2946_v48  ;;  %v2893_v19 = vadd.f32 %v2892_v52, %v5113_v46  ;;  %v4003_v36 = vpop.f32.mrb[78].mxu0  ;;  %vm2962_vm1 = vcmp.gt.f32.partialorder %v2946_v48, 0.0  ;;  %v2993_v59 = vsel %vm2961_vm15, %v2945_v43, %v2977_v17 }
 0x1a8   : > { %v2928_v28 = vmul.f32 %v5122_v31, %v2901_v49  ;;  %v2904_v57 = vadd.f32 %v4003_v36, %v5135_v42  ;;  %v2895_v38 = vpop.f32.mrb[79].mxu0  ;;  %v2996_v61 = vsel %vm2964_vm0, %v2948_v60, %v2980_v26 }
 0x1a9   : > { %v2926_v62 = vmul.f32 %v5122_v31, %v2893_v19  ;;  %v2896_v0 = vadd.f32 %v2895_v38, %v5115_v12  ;;  %v2994_v33 = vsel %vm2962_vm1, %v2946_v48, %v2978_v45  ;;  %v3006_v2 = vpack.c.bf16 %v2996_v61, %v2995_v54 }
 0x1aa   : > { %v2951_v34 = vadd.f32 %v5130_v3, %v2928_v28  ;;  %v2929_v46 = vmul.f32 %v5122_v31, %v2904_v57  ;;  %v3005_v5 = vpack.c.bf16 %v2994_v33, %v2993_v59 }
 0x1ab   : > { %v2949_v7 = vadd.f32 %v5130_v3, %v2926_v62  ;;  %v2927_v9 = vmul.f32 %v5122_v31, %v2896_v0 }
 0x1ac   : > { %v2983_v53 = vmul.f32 0.1, %v2951_v34  ;;  %v2952_v42 = vadd.f32 %v5130_v3, %v2929_v46  ;;  %4028 = vmatprep.mubr.bf16.mxu1 %v3005_v5  ;;  %vm2967_vm2 = vcmp.gt.f32.partialorder %v2951_v34, 0.0 }
 0x1ad   : > { %v2981_v37 = vmul.f32 0.1, %v2949_v7  ;;  %v2950_v16 = vadd.f32 %v5130_v3, %v2927_v9  ;;  %4029 = vmatmul.mubr.bf16.gmra.mrb[72].mxu1 %v3006_v2  ;;  %vm2965_vm3 = vcmp.gt.f32.partialorder %v2949_v7, 0.0  ;;  %v3668_v3 = vld [vmem:[%s5274_s5] ss:$0 sm:$0xff] }
 0x1ae   : > { %v2984_v12 = vmul.f32 0.1, %v2952_v42  ;;  %vm2968_vm4 = vcmp.gt.f32.partialorder %v2952_v42, 0.0  ;;  %v2999_v11 = vsel %vm2967_vm2, %v2951_v34, %v2983_v53 }
 0x1af   : > { %v2982_v10 = vmul.f32 0.1, %v2950_v16  ;;  %vm2966_vm5 = vcmp.gt.f32.partialorder %v2950_v16, 0.0  ;;  %v2997_v55 = vsel %vm2965_vm3, %v2949_v7, %v2981_v37 }
 0x1b0   : > { %v3000_v63 = vsel %vm2968_vm4, %v2952_v42, %v2984_v12 }
 0x1b1   : > { %v2998_v31 = vsel %vm2966_vm5, %v2950_v16, %v2982_v10  ;;  %v3008_v13 = vpack.c.bf16 %v3000_v63, %v2999_v11 }
 0x1b2   : > { %v3007_v14 = vpack.c.bf16 %v2998_v31, %v2997_v55 }
 0x1b4   : > { %4032 = vmatprep.mubr.bf16.mxu1 %v3007_v14 }
 0x1b5   : > { %4033 = vmatmul.mubr.bf16.gmra.mrb[76].mxu1 %v3008_v13 }
 0x270   : > { %v4022_v20 = vpop.f32.mrb[64].mxu1 }
 0x271   : > { %v3123_v15 = vadd.f32 %v4022_v20, %v3668_v3  ;;  %v3114_v18 = vpop.f32.mrb[65].mxu1 }
 0x272   : > { %v3115_v50 = vadd.f32 %v3668_v3, %v3114_v18  ;;  %v4023_v1 = vpop.f32.mrb[66].mxu1 }
 0x273   : > { %3179 = vst [vmem:[%s5187_s13 + $0x10] sm:$0xff] %v3123_v15  ;;  %v3126_v21 = vadd.f32 %v4023_v1, %v3668_v3  ;;  %v3117_v24 = vpop.f32.mrb[67].mxu1 }
 0x274   : > { %3177 = vst [vmem:[%s5187_s13] sm:$0xff] %v3115_v50  ;;  %v3118_v56 = vadd.f32 %v3668_v3, %v3117_v24 }
 0x275   : > { %3180 = vst [vmem:[%s5187_s13 + $0x18] sm:$0xff] %v3126_v21 }
 0x276   : > { %3178 = vst [vmem:[%s5187_s13 + $0x8] sm:$0xff] %v3118_v56 }
 0x278   : > { %v4026_v51 = vpop.f32.mrb[68].mxu1 }
 0x279   : > { %v3139_v27 = vadd.f32 %v4026_v51, %v3668_v3  ;;  %v3130_v4 = vpop.f32.mrb[69].mxu1 }
 0x27a   : > { %v3131_v29 = vadd.f32 %v3668_v3, %v3130_v4  ;;  %v4027_v30 = vpop.f32.mrb[70].mxu1 }
 0x27b   : > { %3183 = vst [vmem:[%s5187_s13 + $0x30] sm:$0xff] %v3139_v27  ;;  %v3142_v6 = vadd.f32 %v4027_v30, %v3668_v3  ;;  %v3133_v32 = vpop.f32.mrb[71].mxu1 }
 0x27c   : > { %3181 = vst [vmem:[%s5187_s13 + $0x20] sm:$0xff] %v3131_v29  ;;  %v3134_v22 = vadd.f32 %v3668_v3, %v3133_v32 }
 0x27d   : > { %3184 = vst [vmem:[%s5187_s13 + $0x38] sm:$0xff] %v3142_v6 }
 0x27e   : > { %3182 = vst [vmem:[%s5187_s13 + $0x28] sm:$0xff] %v3134_v22 }
 0x280   : > { %v4030_v8 = vpop.f32.mrb[72].mxu1 }
 0x281   : > { %v3155_v23 = vadd.f32 %v4030_v8, %v3668_v3  ;;  %v3146_v58 = vpop.f32.mrb[73].mxu1 }
 0x282   : > { %v3147_v39 = vadd.f32 %v3668_v3, %v3146_v58  ;;  %v4031_v40 = vpop.f32.mrb[74].mxu1 }
 0x283   : > { %3187 = vst [vmem:[%s5187_s13 + $0x50] sm:$0xff] %v3155_v23  ;;  %v3158_v35 = vadd.f32 %v4031_v40, %v3668_v3  ;;  %v3149_v41 = vpop.f32.mrb[75].mxu1 }
 0x284   : > { %3185 = vst [vmem:[%s5187_s13 + $0x40] sm:$0xff] %v3147_v39  ;;  %v3150_v43 = vadd.f32 %v3668_v3, %v3149_v41 }
 0x285   : > { %3188 = vst [vmem:[%s5187_s13 + $0x58] sm:$0xff] %v3158_v35 }
 0x286   : > { %3186 = vst [vmem:[%s5187_s13 + $0x48] sm:$0xff] %v3150_v43 }
 0x288   : > { %v4034_v44 = vpop.f32.mrb[76].mxu1 }
 0x289   : > { %v3171_v47 = vadd.f32 %v4034_v44, %v3668_v3  ;;  %v3162_v60 = vpop.f32.mrb[77].mxu1 }
 0x28a   : > { %v3163_v17 = vadd.f32 %v3668_v3, %v3162_v60  ;;  %v4035_v48 = vpop.f32.mrb[78].mxu1 }
 0x28b   : > { %3191 = vst [vmem:[%s5187_s13 + $0x70] sm:$0xff] %v3171_v47  ;;  %v3174_v25 = vadd.f32 %v4035_v48, %v3668_v3  ;;  %v3165_v26 = vpop.f32.mrb[79].mxu1 }
 0x28c   : > { %3189 = vst [vmem:[%s5187_s13 + $0x60] sm:$0xff] %v3163_v17  ;;  %v3166_v49 = vadd.f32 %v3668_v3, %v3165_v26 }
 0x28d   : > { %3192 = vst [vmem:[%s5187_s13 + $0x78] sm:$0xff] %v3174_v25 }
 0x28e   : > { %3190 = vst [vmem:[%s5187_s13 + $0x68] sm:$0xff] %v3166_v49 }
 0x28f   : > { %4227 = shalt.err (!%p4224_p6)
}
 0x290   : > { %s4228_s20 = scalar_lea.hbm %s5208_s18, 2048  ;;  %s4232_s8 = scalar_lea.hbm %s5275_s6, 8192 }
 0x291   : > { %p4229_p7 = scmp.ne.s32.totalorder %s5208_s18, %s4228_s20  ;;  %p4233_p11 = scmp.lt.u32.totalorder %s5208_s18, %s5275_s6 }
 0x292   : > { %p4234_p12 = scmp.lt.u32.totalorder %s4232_s8, %s4228_s20  ;;  %p4236_p0 = scmp.lt.u32.totalorder %s4228_s20, %s5208_s18 }
 0x293   : > { %p4230_p9 = pnand %p4229_p7, %p4399_p3 }
 0x294   : > { %p4235_p13 = por %p4234_p12, %p4233_p11 }
 0x295   : > { %p4231_p10 = pneg %p4230_p9 }
 0x296   : > { %p4237_p1 = por %p4236_p0, %p4235_p13 }
 0x298   : > { %p4238_p2 = pnand %p4237_p1, %p4231_p10 }
 0x29a   : > { %4241 = shalt.err (!%p4238_p2)
}
 0x29b   : > { %s4311_s24 = smov 128   ;;  %s4312_s25 = smov 8  }
 0x29c   : > { %4037 = dma.vmem_to_hbm [thread:$0]  (%p4399_p3), %s5210_s7, 2048, %s5208_s18, %s5217_s16, %s4311_s24, %s4311_s24, %s4312_s25  }
 0x29d PF: > { %p4043_p4 = scmp.ge.s32.totalorder %s4308_s28, 2  ;;  %s3224_s29 = sand.u32 1, %s4280_s21  }
 0x29e   : > { %s3225_s30 = scalar_lea.sflag [#allocation4], %s3224_s29 }
 0x29f   : > { %p4040_p5 = pnand %p4043_p4, %p4408_p8 }
 0x2a1   : > { %4275 = dma.done.wait (!%p4040_p5), %s3225_s30, 2048  }
 0x2a2   : > { %4277 = vsyncadd (!%p4040_p5), %s3225_s30, 4294965248  ;;  %s19_s28 = sadd.s32 1, %s4308_s28   ;;  %s5286_s10 = sld [smem:[#allocation6_spill]] }
 0x2a3   : > { %p16_p6 = scmp.ge.s32.totalorder %s19_s28, 6   ;;  %s5287_s7 = sld [smem:[#allocation7_spill]] }
 0x2a4   : > { %s5288_s21 = smov %s4284_s22  ;;  %s5289_s22 = smov %s4288_s23 }
 0x2a5   : > { %s5290_s23 = smov %s4417_s15  ;;  %s5291_s24 = smov %s4300_s26 }
 0x2a6   : > { %s5292_s25 = smov %s4304_s27  ;;  %18 = sbr.rel (!%p16_p6) target bundleno = 5 (0x5), region = 94 }
 0x2a8   : > { %s5293_s26 = smov %s5286_s10 }
 0x2a9   : > { %s5294_s27 = smov %s5287_s7 }
 0x2ad   :  { %3230 = vsyncpa [#allocation4], 1 }
 0x2ae   :  { %3232 = vsyncpa [#allocation4 + $0x1], 1 }

</bundles_post_ra>
